<compile_context>
chip_gen: v7x
topology: tpu7x:2x2x1
jax: 0.10.0
libtpu: 0.0.40
codegen_flags: <defaults>
</compile_context>

<pallas_src>
import math

import jax
import jax.numpy as jnp
from jax.experimental import pallas as pl
from jax.experimental.pallas import tpu as pltpu


def _round_up(x: int, m: int) -> int:
    return ((x + m - 1) // m) * m


def _make_gather_kernel(tm: int, te: int):
    """Kernel: gather TM weight rows (chunk j of the embedding dim) per grid step."""

    def kernel(ids_ref, w_hbm, o_ref, buf, sem):
        # ids_ref: (n_pad,) int32 in SMEM (scalar prefetch)
        # w_hbm:   (V, E_pad) weight, raw HBM ref (memory_space=pl.ANY)
        # o_ref:   (TM, te) VMEM output block (rows i*TM .. i*TM+TM-1, chunk j)
        # buf:     (TM, te) VMEM gather scratch
        # sem:     (TM,) DMA semaphores
        i = pl.program_id(0)          # row-block index
        j = pl.program_id(1)          # embedding-dim chunk index
        col0 = j * te

        # Issue all TM row-gather DMAs (HBM -> VMEM) before waiting: keeps the
        # DMA engine busy and hides per-row HBM latency.
        copies = []
        for r in range(tm):                          # static unroll, tm <= 32
            row = ids_ref[i * tm + r]                # scalar read from SMEM
            cp = pltpu.make_async_copy(
                w_hbm.at[row, pl.ds(col0, te)],      # (te,) slice of weight row
                buf.at[r],                           # (te,) row of scratch
                sem.at[r],
            )
            cp.start()
            copies.append(cp)
        for cp in copies:
            cp.wait()

        # Single dense store: TM % 8 == 0, te % 128 == 0 -> unmasked vst.
        o_ref[...] = buf[...]

    return kernel


def embedding_forward(ids, weight):
    """Embedding lookup weight[ids]. ids: int array of any shape; weight: (V, E).

    Returns ids.shape + (E,), dtype = weight.dtype (exact row copy).
    """
    orig_shape = ids.shape
    v, e = weight.shape
    n = math.prod(orig_shape) if orig_shape else 1
    itemsize = jnp.dtype(weight.dtype).itemsize

    # Lane-dense embedding dim: pad E to a multiple of 128 (sliced off at the end).
    e_pad = _round_up(e, 128)
    w = weight if e_pad == e else jnp.pad(weight, ((0, 0), (0, e_pad - e)))

    # Rows per grid step: multiple of 8 (dense sublane stores), up to 32.
    tm = 32 if n >= 32 else _round_up(max(n, 1), 8)

    # Embedding-dim tile: use full padded E whenever the per-step VMEM footprint
    # (double-buffered output block + gather scratch ~= 3 * tm * te * itemsize)
    # stays well under the scoped-VMEM default on every generation (v5e: 16 MiB).
    budget = 6 * 1024 * 1024
    max_te = max(128, (budget // (3 * tm * itemsize)) // 128 * 128)
    if e_pad <= max_te:
        te = e_pad
    else:
        te = 128
        for d in range(e_pad // 128, 0, -1):
            cand = d * 128
            if cand <= max_te and e_pad % cand == 0:
                te = cand
                break

    n_pad = _round_up(n, tm)
    # Clamp so padded / out-of-range ids can never trigger an OOB DMA.
    # TODO(synk): torch.nn.Embedding errors on out-of-range ids; we clamp instead.
    ids_flat = jnp.clip(ids.reshape(n).astype(jnp.int32), 0, v - 1)
    if n_pad != n:
        ids_flat = jnp.pad(ids_flat, (0, n_pad - n))

    grid = (n_pad // tm, e_pad // te)

    out = pl.pallas_call(
        _make_gather_kernel(tm, te),
        out_shape=jax.ShapeDtypeStruct((n_pad, e_pad), weight.dtype),
        grid_spec=pltpu.PrefetchScalarGridSpec(
            num_scalar_prefetch=1,
            grid=grid,
            in_specs=[
                # Weight stays in HBM; the kernel gathers rows with manual DMAs.
                pl.BlockSpec(memory_space=pl.ANY),
            ],
            out_specs=pl.BlockSpec((tm, te), lambda i, j, ids: (i, j)),
            scratch_shapes=[
                pltpu.VMEM((tm, te), weight.dtype),
                pltpu.SemaphoreType.DMA((tm,)),
            ],
        ),
        compiler_params=pltpu.CompilerParams(
            # Row blocks are independent -> "parallel" lets v7x's 2 TensorCores
            # split them (no-op on v5e/v6e); E-chunk axis stays "arbitrary".
            dimension_semantics=("parallel", "arbitrary"),
        ),
    )(ids_flat, w)

    out = out[:n, :e]
    return out.reshape(*orig_shape, e)


if __name__ == "__main__":
    # Module shapes: Embedding(vocab_size, embedding_size); ids of shape (batch, seq).
    vocab_size = 64
    embedding_size = 128
    batch, seq = 2, 8

    key = jax.random.PRNGKey(0)
    k_w, k_ids = jax.random.split(key)

    weight = jax.random.normal(k_w, (vocab_size, embedding_size), dtype=jnp.float32)
    ids = jax.random.randint(k_ids, (batch, seq), 0, vocab_size, dtype=jnp.int32)

    out = embedding_forward(ids, weight)
    out = jax.block_until_ready(out)

    # Reference: plain JAX gather (== torch's self.weight[ids]); row copy is exact.
    ref = weight[ids]
    assert out.shape == (batch, seq, embedding_size)
    assert jnp.array_equal(out, ref), "mismatch vs reference gather"

    # TODO(synk): `unembed` (einsum '...j,kj->...k' / sqrt(E)) is not part of
    # forward(); it would be a standard tiled MXU matmul kernel.

    print("KERNEL_OK")
</pallas_src>

<mosaic_0001>
module attributes {stable_mosaic.version = 11 : i64} {
  func.func @kernel(%arg0: i32, %arg1: i32, %arg2: memref<16xi32, #tpu.memory_space<smem>>, %arg3: memref<64x128xf32, #tpu.memory_space<any>>, %arg4: memref<16x128xf32, #tpu.memory_space<vmem>>, %arg5: memref<16x128xf32, #tpu.memory_space<vmem>>, %arg6: memref<16x!tpu.dma_semaphore, #tpu.memory_space<semaphore_mem>>) attributes {dimension_semantics = [#tpu.dimension_semantics<parallel>, #tpu.dimension_semantics<arbitrary>], iteration_bounds = array<i64: 1, 1>, scalar_prefetch = 1 : i64, scratch_operands = 2 : i64, tpu.core_type = #tpu.core_type<tc>, window_params = [{}, {transform_indices = @transform_1, window_bounds = array<i64: 16, 128>}]} {
    %c128_i32 = arith.constant 128 : i32
    %0 = arith.muli %arg1, %c128_i32 : i32
    %c16_i32 = arith.constant 16 : i32
    %1 = arith.muli %arg0, %c16_i32 : i32
    %c0_i32 = arith.constant 0 : i32
    %2 = arith.addi %1, %c0_i32 : i32
    %3 = arith.index_cast %2 : i32 to index
    %4 = memref.load %arg2[%3] : memref<16xi32, #tpu.memory_space<smem>>
    %c0_i32_0 = arith.constant 0 : i32
    %c0_i32_1 = arith.constant 0 : i32
    %5 = tpu.memref_slice %arg3[%4, %0] : memref<64x128xf32, #tpu.memory_space<any>> -> memref<1x128xf32, #tpu.memory_space<any>>
    %6 = tpu.memref_squeeze %5 : memref<1x128xf32, #tpu.memory_space<any>> -> memref<128xf32, #tpu.memory_space<any>>
    %c0_i32_2 = arith.constant 0 : i32
    %7 = tpu.memref_slice %arg5[%c0_i32_0, %c0_i32_2] : memref<16x128xf32, #tpu.memory_space<vmem>> -> memref<1x128xf32, #tpu.memory_space<vmem>>
    %8 = tpu.memref_squeeze %7 : memref<1x128xf32, #tpu.memory_space<vmem>> -> memref<128xf32, #tpu.memory_space<vmem>>
    %9 = tpu.memref_slice %arg6[%c0_i32_1] : memref<16x!tpu.dma_semaphore, #tpu.memory_space<semaphore_mem>> -> memref<1x!tpu.dma_semaphore, #tpu.memory_space<semaphore_mem>>
    %10 = tpu.memref_squeeze %9 : memref<1x!tpu.dma_semaphore, #tpu.memory_space<semaphore_mem>> -> memref<!tpu.dma_semaphore, #tpu.memory_space<semaphore_mem>>
    tpu.enqueue_dma source(%6 : memref<128xf32, #tpu.memory_space<any>>) target(%8 : memref<128xf32, #tpu.memory_space<vmem>>) target_semaphore(%10 : memref<!tpu.dma_semaphore, #tpu.memory_space<semaphore_mem>>)
    %c16_i32_3 = arith.constant 16 : i32
    %11 = arith.muli %arg0, %c16_i32_3 : i32
    %c1_i32 = arith.constant 1 : i32
    %12 = arith.addi %11, %c1_i32 : i32
    %13 = arith.index_cast %12 : i32 to index
    %14 = memref.load %arg2[%13] : memref<16xi32, #tpu.memory_space<smem>>
    %c1_i32_4 = arith.constant 1 : i32
    %c1_i32_5 = arith.constant 1 : i32
    %15 = tpu.memref_slice %arg3[%14, %0] : memref<64x128xf32, #tpu.memory_space<any>> -> memref<1x128xf32, #tpu.memory_space<any>>
    %16 = tpu.memref_squeeze %15 : memref<1x128xf32, #tpu.memory_space<any>> -> memref<128xf32, #tpu.memory_space<any>>
    %c0_i32_6 = arith.constant 0 : i32
    %17 = tpu.memref_slice %arg5[%c1_i32_4, %c0_i32_6] : memref<16x128xf32, #tpu.memory_space<vmem>> -> memref<1x128xf32, #tpu.memory_space<vmem>>
    %18 = tpu.memref_squeeze %17 : memref<1x128xf32, #tpu.memory_space<vmem>> -> memref<128xf32, #tpu.memory_space<vmem>>
    %19 = tpu.memref_slice %arg6[%c1_i32_5] : memref<16x!tpu.dma_semaphore, #tpu.memory_space<semaphore_mem>> -> memref<1x!tpu.dma_semaphore, #tpu.memory_space<semaphore_mem>>
    %20 = tpu.memref_squeeze %19 : memref<1x!tpu.dma_semaphore, #tpu.memory_space<semaphore_mem>> -> memref<!tpu.dma_semaphore, #tpu.memory_space<semaphore_mem>>
    tpu.enqueue_dma source(%16 : memref<128xf32, #tpu.memory_space<any>>) target(%18 : memref<128xf32, #tpu.memory_space<vmem>>) target_semaphore(%20 : memref<!tpu.dma_semaphore, #tpu.memory_space<semaphore_mem>>)
    %c16_i32_7 = arith.constant 16 : i32
    %21 = arith.muli %arg0, %c16_i32_7 : i32
    %c2_i32 = arith.constant 2 : i32
    %22 = arith.addi %21, %c2_i32 : i32
    %23 = arith.index_cast %22 : i32 to index
    %24 = memref.load %arg2[%23] : memref<16xi32, #tpu.memory_space<smem>>
    %c2_i32_8 = arith.constant 2 : i32
    %c2_i32_9 = arith.constant 2 : i32
    %25 = tpu.memref_slice %arg3[%24, %0] : memref<64x128xf32, #tpu.memory_space<any>> -> memref<1x128xf32, #tpu.memory_space<any>>
    %26 = tpu.memref_squeeze %25 : memref<1x128xf32, #tpu.memory_space<any>> -> memref<128xf32, #tpu.memory_space<any>>
    %c0_i32_10 = arith.constant 0 : i32
    %27 = tpu.memref_slice %arg5[%c2_i32_8, %c0_i32_10] : memref<16x128xf32, #tpu.memory_space<vmem>> -> memref<1x128xf32, #tpu.memory_space<vmem>>
    %28 = tpu.memref_squeeze %27 : memref<1x128xf32, #tpu.memory_space<vmem>> -> memref<128xf32, #tpu.memory_space<vmem>>
    %29 = tpu.memref_slice %arg6[%c2_i32_9] : memref<16x!tpu.dma_semaphore, #tpu.memory_space<semaphore_mem>> -> memref<1x!tpu.dma_semaphore, #tpu.memory_space<semaphore_mem>>
    %30 = tpu.memref_squeeze %29 : memref<1x!tpu.dma_semaphore, #tpu.memory_space<semaphore_mem>> -> memref<!tpu.dma_semaphore, #tpu.memory_space<semaphore_mem>>
    tpu.enqueue_dma source(%26 : memref<128xf32, #tpu.memory_space<any>>) target(%28 : memref<128xf32, #tpu.memory_space<vmem>>) target_semaphore(%30 : memref<!tpu.dma_semaphore, #tpu.memory_space<semaphore_mem>>)
    %c16_i32_11 = arith.constant 16 : i32
    %31 = arith.muli %arg0, %c16_i32_11 : i32
    %c3_i32 = arith.constant 3 : i32
    %32 = arith.addi %31, %c3_i32 : i32
    %33 = arith.index_cast %32 : i32 to index
    %34 = memref.load %arg2[%33] : memref<16xi32, #tpu.memory_space<smem>>
    %c3_i32_12 = arith.constant 3 : i32
    %c3_i32_13 = arith.constant 3 : i32
    %35 = tpu.memref_slice %arg3[%34, %0] : memref<64x128xf32, #tpu.memory_space<any>> -> memref<1x128xf32, #tpu.memory_space<any>>
    %36 = tpu.memref_squeeze %35 : memref<1x128xf32, #tpu.memory_space<any>> -> memref<128xf32, #tpu.memory_space<any>>
    %c0_i32_14 = arith.constant 0 : i32
    %37 = tpu.memref_slice %arg5[%c3_i32_12, %c0_i32_14] : memref<16x128xf32, #tpu.memory_space<vmem>> -> memref<1x128xf32, #tpu.memory_space<vmem>>
    %38 = tpu.memref_squeeze %37 : memref<1x128xf32, #tpu.memory_space<vmem>> -> memref<128xf32, #tpu.memory_space<vmem>>
    %39 = tpu.memref_slice %arg6[%c3_i32_13] : memref<16x!tpu.dma_semaphore, #tpu.memory_space<semaphore_mem>> -> memref<1x!tpu.dma_semaphore, #tpu.memory_space<semaphore_mem>>
    %40 = tpu.memref_squeeze %39 : memref<1x!tpu.dma_semaphore, #tpu.memory_space<semaphore_mem>> -> memref<!tpu.dma_semaphore, #tpu.memory_space<semaphore_mem>>
    tpu.enqueue_dma source(%36 : memref<128xf32, #tpu.memory_space<any>>) target(%38 : memref<128xf32, #tpu.memory_space<vmem>>) target_semaphore(%40 : memref<!tpu.dma_semaphore, #tpu.memory_space<semaphore_mem>>)
    %c16_i32_15 = arith.constant 16 : i32
    %41 = arith.muli %arg0, %c16_i32_15 : i32
    %c4_i32 = arith.constant 4 : i32
    %42 = arith.addi %41, %c4_i32 : i32
    %43 = arith.index_cast %42 : i32 to index
    %44 = memref.load %arg2[%43] : memref<16xi32, #tpu.memory_space<smem>>
    %c4_i32_16 = arith.constant 4 : i32
    %c4_i32_17 = arith.constant 4 : i32
    %45 = tpu.memref_slice %arg3[%44, %0] : memref<64x128xf32, #tpu.memory_space<any>> -> memref<1x128xf32, #tpu.memory_space<any>>
    %46 = tpu.memref_squeeze %45 : memref<1x128xf32, #tpu.memory_space<any>> -> memref<128xf32, #tpu.memory_space<any>>
    %c0_i32_18 = arith.constant 0 : i32
    %47 = tpu.memref_slice %arg5[%c4_i32_16, %c0_i32_18] : memref<16x128xf32, #tpu.memory_space<vmem>> -> memref<1x128xf32, #tpu.memory_space<vmem>>
    %48 = tpu.memref_squeeze %47 : memref<1x128xf32, #tpu.memory_space<vmem>> -> memref<128xf32, #tpu.memory_space<vmem>>
    %49 = tpu.memref_slice %arg6[%c4_i32_17] : memref<16x!tpu.dma_semaphore, #tpu.memory_space<semaphore_mem>> -> memref<1x!tpu.dma_semaphore, #tpu.memory_space<semaphore_mem>>
    %50 = tpu.memref_squeeze %49 : memref<1x!tpu.dma_semaphore, #tpu.memory_space<semaphore_mem>> -> memref<!tpu.dma_semaphore, #tpu.memory_space<semaphore_mem>>
    tpu.enqueue_dma source(%46 : memref<128xf32, #tpu.memory_space<any>>) target(%48 : memref<128xf32, #tpu.memory_space<vmem>>) target_semaphore(%50 : memref<!tpu.dma_semaphore, #tpu.memory_space<semaphore_mem>>)
    %c16_i32_19 = arith.constant 16 : i32
    %51 = arith.muli %arg0, %c16_i32_19 : i32
    %c5_i32 = arith.constant 5 : i32
    %52 = arith.addi %51, %c5_i32 : i32
    %53 = arith.index_cast %52 : i32 to index
    %54 = memref.load %arg2[%53] : memref<16xi32, #tpu.memory_space<smem>>
    %c5_i32_20 = arith.constant 5 : i32
    %c5_i32_21 = arith.constant 5 : i32
    %55 = tpu.memref_slice %arg3[%54, %0] : memref<64x128xf32, #tpu.memory_space<any>> -> memref<1x128xf32, #tpu.memory_space<any>>
    %56 = tpu.memref_squeeze %55 : memref<1x128xf32, #tpu.memory_space<any>> -> memref<128xf32, #tpu.memory_space<any>>
    %c0_i32_22 = arith.constant 0 : i32
    %57 = tpu.memref_slice %arg5[%c5_i32_20, %c0_i32_22] : memref<16x128xf32, #tpu.memory_space<vmem>> -> memref<1x128xf32, #tpu.memory_space<vmem>>
    %58 = tpu.memref_squeeze %57 : memref<1x128xf32, #tpu.memory_space<vmem>> -> memref<128xf32, #tpu.memory_space<vmem>>
    %59 = tpu.memref_slice %arg6[%c5_i32_21] : memref<16x!tpu.dma_semaphore, #tpu.memory_space<semaphore_mem>> -> memref<1x!tpu.dma_semaphore, #tpu.memory_space<semaphore_mem>>
    %60 = tpu.memref_squeeze %59 : memref<1x!tpu.dma_semaphore, #tpu.memory_space<semaphore_mem>> -> memref<!tpu.dma_semaphore, #tpu.memory_space<semaphore_mem>>
    tpu.enqueue_dma source(%56 : memref<128xf32, #tpu.memory_space<any>>) target(%58 : memref<128xf32, #tpu.memory_space<vmem>>) target_semaphore(%60 : memref<!tpu.dma_semaphore, #tpu.memory_space<semaphore_mem>>)
    %c16_i32_23 = arith.constant 16 : i32
    %61 = arith.muli %arg0, %c16_i32_23 : i32
    %c6_i32 = arith.constant 6 : i32
    %62 = arith.addi %61, %c6_i32 : i32
    %63 = arith.index_cast %62 : i32 to index
    %64 = memref.load %arg2[%63] : memref<16xi32, #tpu.memory_space<smem>>
    %c6_i32_24 = arith.constant 6 : i32
    %c6_i32_25 = arith.constant 6 : i32
    %65 = tpu.memref_slice %arg3[%64, %0] : memref<64x128xf32, #tpu.memory_space<any>> -> memref<1x128xf32, #tpu.memory_space<any>>
    %66 = tpu.memref_squeeze %65 : memref<1x128xf32, #tpu.memory_space<any>> -> memref<128xf32, #tpu.memory_space<any>>
    %c0_i32_26 = arith.constant 0 : i32
    %67 = tpu.memref_slice %arg5[%c6_i32_24, %c0_i32_26] : memref<16x128xf32, #tpu.memory_space<vmem>> -> memref<1x128xf32, #tpu.memory_space<vmem>>
    %68 = tpu.memref_squeeze %67 : memref<1x128xf32, #tpu.memory_space<vmem>> -> memref<128xf32, #tpu.memory_space<vmem>>
    %69 = tpu.memref_slice %arg6[%c6_i32_25] : memref<16x!tpu.dma_semaphore, #tpu.memory_space<semaphore_mem>> -> memref<1x!tpu.dma_semaphore, #tpu.memory_space<semaphore_mem>>
    %70 = tpu.memref_squeeze %69 : memref<1x!tpu.dma_semaphore, #tpu.memory_space<semaphore_mem>> -> memref<!tpu.dma_semaphore, #tpu.memory_space<semaphore_mem>>
    tpu.enqueue_dma source(%66 : memref<128xf32, #tpu.memory_space<any>>) target(%68 : memref<128xf32, #tpu.memory_space<vmem>>) target_semaphore(%70 : memref<!tpu.dma_semaphore, #tpu.memory_space<semaphore_mem>>)
    %c16_i32_27 = arith.constant 16 : i32
    %71 = arith.muli %arg0, %c16_i32_27 : i32
    %c7_i32 = arith.constant 7 : i32
    %72 = arith.addi %71, %c7_i32 : i32
    %73 = arith.index_cast %72 : i32 to index
    %74 = memref.load %arg2[%73] : memref<16xi32, #tpu.memory_space<smem>>
    %c7_i32_28 = arith.constant 7 : i32
    %c7_i32_29 = arith.constant 7 : i32
    %75 = tpu.memref_slice %arg3[%74, %0] : memref<64x128xf32, #tpu.memory_space<any>> -> memref<1x128xf32, #tpu.memory_space<any>>
    %76 = tpu.memref_squeeze %75 : memref<1x128xf32, #tpu.memory_space<any>> -> memref<128xf32, #tpu.memory_space<any>>
    %c0_i32_30 = arith.constant 0 : i32
    %77 = tpu.memref_slice %arg5[%c7_i32_28, %c0_i32_30] : memref<16x128xf32, #tpu.memory_space<vmem>> -> memref<1x128xf32, #tpu.memory_space<vmem>>
    %78 = tpu.memref_squeeze %77 : memref<1x128xf32, #tpu.memory_space<vmem>> -> memref<128xf32, #tpu.memory_space<vmem>>
    %79 = tpu.memref_slice %arg6[%c7_i32_29] : memref<16x!tpu.dma_semaphore, #tpu.memory_space<semaphore_mem>> -> memref<1x!tpu.dma_semaphore, #tpu.memory_space<semaphore_mem>>
    %80 = tpu.memref_squeeze %79 : memref<1x!tpu.dma_semaphore, #tpu.memory_space<semaphore_mem>> -> memref<!tpu.dma_semaphore, #tpu.memory_space<semaphore_mem>>
    tpu.enqueue_dma source(%76 : memref<128xf32, #tpu.memory_space<any>>) target(%78 : memref<128xf32, #tpu.memory_space<vmem>>) target_semaphore(%80 : memref<!tpu.dma_semaphore, #tpu.memory_space<semaphore_mem>>)
    %c16_i32_31 = arith.constant 16 : i32
    %81 = arith.muli %arg0, %c16_i32_31 : i32
    %c8_i32 = arith.constant 8 : i32
    %82 = arith.addi %81, %c8_i32 : i32
    %83 = arith.index_cast %82 : i32 to index
    %84 = memref.load %arg2[%83] : memref<16xi32, #tpu.memory_space<smem>>
    %c8_i32_32 = arith.constant 8 : i32
    %c8_i32_33 = arith.constant 8 : i32
    %85 = tpu.memref_slice %arg3[%84, %0] : memref<64x128xf32, #tpu.memory_space<any>> -> memref<1x128xf32, #tpu.memory_space<any>>
    %86 = tpu.memref_squeeze %85 : memref<1x128xf32, #tpu.memory_space<any>> -> memref<128xf32, #tpu.memory_space<any>>
    %c0_i32_34 = arith.constant 0 : i32
    %87 = tpu.memref_slice %arg5[%c8_i32_32, %c0_i32_34] : memref<16x128xf32, #tpu.memory_space<vmem>> -> memref<1x128xf32, #tpu.memory_space<vmem>>
    %88 = tpu.memref_squeeze %87 : memref<1x128xf32, #tpu.memory_space<vmem>> -> memref<128xf32, #tpu.memory_space<vmem>>
    %89 = tpu.memref_slice %arg6[%c8_i32_33] : memref<16x!tpu.dma_semaphore, #tpu.memory_space<semaphore_mem>> -> memref<1x!tpu.dma_semaphore, #tpu.memory_space<semaphore_mem>>
    %90 = tpu.memref_squeeze %89 : memref<1x!tpu.dma_semaphore, #tpu.memory_space<semaphore_mem>> -> memref<!tpu.dma_semaphore, #tpu.memory_space<semaphore_mem>>
    tpu.enqueue_dma source(%86 : memref<128xf32, #tpu.memory_space<any>>) target(%88 : memref<128xf32, #tpu.memory_space<vmem>>) target_semaphore(%90 : memref<!tpu.dma_semaphore, #tpu.memory_space<semaphore_mem>>)
    %c16_i32_35 = arith.constant 16 : i32
    %91 = arith.muli %arg0, %c16_i32_35 : i32
    %c9_i32 = arith.constant 9 : i32
    %92 = arith.addi %91, %c9_i32 : i32
    %93 = arith.index_cast %92 : i32 to index
    %94 = memref.load %arg2[%93] : memref<16xi32, #tpu.memory_space<smem>>
    %c9_i32_36 = arith.constant 9 : i32
    %c9_i32_37 = arith.constant 9 : i32
    %95 = tpu.memref_slice %arg3[%94, %0] : memref<64x128xf32, #tpu.memory_space<any>> -> memref<1x128xf32, #tpu.memory_space<any>>
    %96 = tpu.memref_squeeze %95 : memref<1x128xf32, #tpu.memory_space<any>> -> memref<128xf32, #tpu.memory_space<any>>
    %c0_i32_38 = arith.constant 0 : i32
    %97 = tpu.memref_slice %arg5[%c9_i32_36, %c0_i32_38] : memref<16x128xf32, #tpu.memory_space<vmem>> -> memref<1x128xf32, #tpu.memory_space<vmem>>
    %98 = tpu.memref_squeeze %97 : memref<1x128xf32, #tpu.memory_space<vmem>> -> memref<128xf32, #tpu.memory_space<vmem>>
    %99 = tpu.memref_slice %arg6[%c9_i32_37] : memref<16x!tpu.dma_semaphore, #tpu.memory_space<semaphore_mem>> -> memref<1x!tpu.dma_semaphore, #tpu.memory_space<semaphore_mem>>
    %100 = tpu.memref_squeeze %99 : memref<1x!tpu.dma_semaphore, #tpu.memory_space<semaphore_mem>> -> memref<!tpu.dma_semaphore, #tpu.memory_space<semaphore_mem>>
    tpu.enqueue_dma source(%96 : memref<128xf32, #tpu.memory_space<any>>) target(%98 : memref<128xf32, #tpu.memory_space<vmem>>) target_semaphore(%100 : memref<!tpu.dma_semaphore, #tpu.memory_space<semaphore_mem>>)
    %c16_i32_39 = arith.constant 16 : i32
    %101 = arith.muli %arg0, %c16_i32_39 : i32
    %c10_i32 = arith.constant 10 : i32
    %102 = arith.addi %101, %c10_i32 : i32
    %103 = arith.index_cast %102 : i32 to index
    %104 = memref.load %arg2[%103] : memref<16xi32, #tpu.memory_space<smem>>
    %c10_i32_40 = arith.constant 10 : i32
    %c10_i32_41 = arith.constant 10 : i32
    %105 = tpu.memref_slice %arg3[%104, %0] : memref<64x128xf32, #tpu.memory_space<any>> -> memref<1x128xf32, #tpu.memory_space<any>>
    %106 = tpu.memref_squeeze %105 : memref<1x128xf32, #tpu.memory_space<any>> -> memref<128xf32, #tpu.memory_space<any>>
    %c0_i32_42 = arith.constant 0 : i32
    %107 = tpu.memref_slice %arg5[%c10_i32_40, %c0_i32_42] : memref<16x128xf32, #tpu.memory_space<vmem>> -> memref<1x128xf32, #tpu.memory_space<vmem>>
    %108 = tpu.memref_squeeze %107 : memref<1x128xf32, #tpu.memory_space<vmem>> -> memref<128xf32, #tpu.memory_space<vmem>>
    %109 = tpu.memref_slice %arg6[%c10_i32_41] : memref<16x!tpu.dma_semaphore, #tpu.memory_space<semaphore_mem>> -> memref<1x!tpu.dma_semaphore, #tpu.memory_space<semaphore_mem>>
    %110 = tpu.memref_squeeze %109 : memref<1x!tpu.dma_semaphore, #tpu.memory_space<semaphore_mem>> -> memref<!tpu.dma_semaphore, #tpu.memory_space<semaphore_mem>>
    tpu.enqueue_dma source(%106 : memref<128xf32, #tpu.memory_space<any>>) target(%108 : memref<128xf32, #tpu.memory_space<vmem>>) target_semaphore(%110 : memref<!tpu.dma_semaphore, #tpu.memory_space<semaphore_mem>>)
    %c16_i32_43 = arith.constant 16 : i32
    %111 = arith.muli %arg0, %c16_i32_43 : i32
    %c11_i32 = arith.constant 11 : i32
    %112 = arith.addi %111, %c11_i32 : i32
    %113 = arith.index_cast %112 : i32 to index
    %114 = memref.load %arg2[%113] : memref<16xi32, #tpu.memory_space<smem>>
    %c11_i32_44 = arith.constant 11 : i32
    %c11_i32_45 = arith.constant 11 : i32
    %115 = tpu.memref_slice %arg3[%114, %0] : memref<64x128xf32, #tpu.memory_space<any>> -> memref<1x128xf32, #tpu.memory_space<any>>
    %116 = tpu.memref_squeeze %115 : memref<1x128xf32, #tpu.memory_space<any>> -> memref<128xf32, #tpu.memory_space<any>>
    %c0_i32_46 = arith.constant 0 : i32
    %117 = tpu.memref_slice %arg5[%c11_i32_44, %c0_i32_46] : memref<16x128xf32, #tpu.memory_space<vmem>> -> memref<1x128xf32, #tpu.memory_space<vmem>>
    %118 = tpu.memref_squeeze %117 : memref<1x128xf32, #tpu.memory_space<vmem>> -> memref<128xf32, #tpu.memory_space<vmem>>
    %119 = tpu.memref_slice %arg6[%c11_i32_45] : memref<16x!tpu.dma_semaphore, #tpu.memory_space<semaphore_mem>> -> memref<1x!tpu.dma_semaphore, #tpu.memory_space<semaphore_mem>>
    %120 = tpu.memref_squeeze %119 : memref<1x!tpu.dma_semaphore, #tpu.memory_space<semaphore_mem>> -> memref<!tpu.dma_semaphore, #tpu.memory_space<semaphore_mem>>
    tpu.enqueue_dma source(%116 : memref<128xf32, #tpu.memory_space<any>>) target(%118 : memref<128xf32, #tpu.memory_space<vmem>>) target_semaphore(%120 : memref<!tpu.dma_semaphore, #tpu.memory_space<semaphore_mem>>)
    %c16_i32_47 = arith.constant 16 : i32
    %121 = arith.muli %arg0, %c16_i32_47 : i32
    %c12_i32 = arith.constant 12 : i32
    %122 = arith.addi %121, %c12_i32 : i32
    %123 = arith.index_cast %122 : i32 to index
    %124 = memref.load %arg2[%123] : memref<16xi32, #tpu.memory_space<smem>>
    %c12_i32_48 = arith.constant 12 : i32
    %c12_i32_49 = arith.constant 12 : i32
    %125 = tpu.memref_slice %arg3[%124, %0] : memref<64x128xf32, #tpu.memory_space<any>> -> memref<1x128xf32, #tpu.memory_space<any>>
    %126 = tpu.memref_squeeze %125 : memref<1x128xf32, #tpu.memory_space<any>> -> memref<128xf32, #tpu.memory_space<any>>
    %c0_i32_50 = arith.constant 0 : i32
    %127 = tpu.memref_slice %arg5[%c12_i32_48, %c0_i32_50] : memref<16x128xf32, #tpu.memory_space<vmem>> -> memref<1x128xf32, #tpu.memory_space<vmem>>
    %128 = tpu.memref_squeeze %127 : memref<1x128xf32, #tpu.memory_space<vmem>> -> memref<128xf32, #tpu.memory_space<vmem>>
    %129 = tpu.memref_slice %arg6[%c12_i32_49] : memref<16x!tpu.dma_semaphore, #tpu.memory_space<semaphore_mem>> -> memref<1x!tpu.dma_semaphore, #tpu.memory_space<semaphore_mem>>
    %130 = tpu.memref_squeeze %129 : memref<1x!tpu.dma_semaphore, #tpu.memory_space<semaphore_mem>> -> memref<!tpu.dma_semaphore, #tpu.memory_space<semaphore_mem>>
    tpu.enqueue_dma source(%126 : memref<128xf32, #tpu.memory_space<any>>) target(%128 : memref<128xf32, #tpu.memory_space<vmem>>) target_semaphore(%130 : memref<!tpu.dma_semaphore, #tpu.memory_space<semaphore_mem>>)
    %c16_i32_51 = arith.constant 16 : i32
    %131 = arith.muli %arg0, %c16_i32_51 : i32
    %c13_i32 = arith.constant 13 : i32
    %132 = arith.addi %131, %c13_i32 : i32
    %133 = arith.index_cast %132 : i32 to index
    %134 = memref.load %arg2[%133] : memref<16xi32, #tpu.memory_space<smem>>
    %c13_i32_52 = arith.constant 13 : i32
    %c13_i32_53 = arith.constant 13 : i32
    %135 = tpu.memref_slice %arg3[%134, %0] : memref<64x128xf32, #tpu.memory_space<any>> -> memref<1x128xf32, #tpu.memory_space<any>>
    %136 = tpu.memref_squeeze %135 : memref<1x128xf32, #tpu.memory_space<any>> -> memref<128xf32, #tpu.memory_space<any>>
    %c0_i32_54 = arith.constant 0 : i32
    %137 = tpu.memref_slice %arg5[%c13_i32_52, %c0_i32_54] : memref<16x128xf32, #tpu.memory_space<vmem>> -> memref<1x128xf32, #tpu.memory_space<vmem>>
    %138 = tpu.memref_squeeze %137 : memref<1x128xf32, #tpu.memory_space<vmem>> -> memref<128xf32, #tpu.memory_space<vmem>>
    %139 = tpu.memref_slice %arg6[%c13_i32_53] : memref<16x!tpu.dma_semaphore, #tpu.memory_space<semaphore_mem>> -> memref<1x!tpu.dma_semaphore, #tpu.memory_space<semaphore_mem>>
    %140 = tpu.memref_squeeze %139 : memref<1x!tpu.dma_semaphore, #tpu.memory_space<semaphore_mem>> -> memref<!tpu.dma_semaphore, #tpu.memory_space<semaphore_mem>>
    tpu.enqueue_dma source(%136 : memref<128xf32, #tpu.memory_space<any>>) target(%138 : memref<128xf32, #tpu.memory_space<vmem>>) target_semaphore(%140 : memref<!tpu.dma_semaphore, #tpu.memory_space<semaphore_mem>>)
    %c16_i32_55 = arith.constant 16 : i32
    %141 = arith.muli %arg0, %c16_i32_55 : i32
    %c14_i32 = arith.constant 14 : i32
    %142 = arith.addi %141, %c14_i32 : i32
    %143 = arith.index_cast %142 : i32 to index
    %144 = memref.load %arg2[%143] : memref<16xi32, #tpu.memory_space<smem>>
    %c14_i32_56 = arith.constant 14 : i32
    %c14_i32_57 = arith.constant 14 : i32
    %145 = tpu.memref_slice %arg3[%144, %0] : memref<64x128xf32, #tpu.memory_space<any>> -> memref<1x128xf32, #tpu.memory_space<any>>
    %146 = tpu.memref_squeeze %145 : memref<1x128xf32, #tpu.memory_space<any>> -> memref<128xf32, #tpu.memory_space<any>>
    %c0_i32_58 = arith.constant 0 : i32
    %147 = tpu.memref_slice %arg5[%c14_i32_56, %c0_i32_58] : memref<16x128xf32, #tpu.memory_space<vmem>> -> memref<1x128xf32, #tpu.memory_space<vmem>>
    %148 = tpu.memref_squeeze %147 : memref<1x128xf32, #tpu.memory_space<vmem>> -> memref<128xf32, #tpu.memory_space<vmem>>
    %149 = tpu.memref_slice %arg6[%c14_i32_57] : memref<16x!tpu.dma_semaphore, #tpu.memory_space<semaphore_mem>> -> memref<1x!tpu.dma_semaphore, #tpu.memory_space<semaphore_mem>>
    %150 = tpu.memref_squeeze %149 : memref<1x!tpu.dma_semaphore, #tpu.memory_space<semaphore_mem>> -> memref<!tpu.dma_semaphore, #tpu.memory_space<semaphore_mem>>
    tpu.enqueue_dma source(%146 : memref<128xf32, #tpu.memory_space<any>>) target(%148 : memref<128xf32, #tpu.memory_space<vmem>>) target_semaphore(%150 : memref<!tpu.dma_semaphore, #tpu.memory_space<semaphore_mem>>)
    %c16_i32_59 = arith.constant 16 : i32
    %151 = arith.muli %arg0, %c16_i32_59 : i32
    %c15_i32 = arith.constant 15 : i32
    %152 = arith.addi %151, %c15_i32 : i32
    %153 = arith.index_cast %152 : i32 to index
    %154 = memref.load %arg2[%153] : memref<16xi32, #tpu.memory_space<smem>>
    %c15_i32_60 = arith.constant 15 : i32
    %c15_i32_61 = arith.constant 15 : i32
    %155 = tpu.memref_slice %arg3[%154, %0] : memref<64x128xf32, #tpu.memory_space<any>> -> memref<1x128xf32, #tpu.memory_space<any>>
    %156 = tpu.memref_squeeze %155 : memref<1x128xf32, #tpu.memory_space<any>> -> memref<128xf32, #tpu.memory_space<any>>
    %c0_i32_62 = arith.constant 0 : i32
    %157 = tpu.memref_slice %arg5[%c15_i32_60, %c0_i32_62] : memref<16x128xf32, #tpu.memory_space<vmem>> -> memref<1x128xf32, #tpu.memory_space<vmem>>
    %158 = tpu.memref_squeeze %157 : memref<1x128xf32, #tpu.memory_space<vmem>> -> memref<128xf32, #tpu.memory_space<vmem>>
    %159 = tpu.memref_slice %arg6[%c15_i32_61] : memref<16x!tpu.dma_semaphore, #tpu.memory_space<semaphore_mem>> -> memref<1x!tpu.dma_semaphore, #tpu.memory_space<semaphore_mem>>
    %160 = tpu.memref_squeeze %159 : memref<1x!tpu.dma_semaphore, #tpu.memory_space<semaphore_mem>> -> memref<!tpu.dma_semaphore, #tpu.memory_space<semaphore_mem>>
    tpu.enqueue_dma source(%156 : memref<128xf32, #tpu.memory_space<any>>) target(%158 : memref<128xf32, #tpu.memory_space<vmem>>) target_semaphore(%160 : memref<!tpu.dma_semaphore, #tpu.memory_space<semaphore_mem>>)
    %c0_i32_63 = arith.constant 0 : i32
    %c0_i32_64 = arith.constant 0 : i32
    %161 = tpu.memref_slice %arg3[%4, %0] : memref<64x128xf32, #tpu.memory_space<any>> -> memref<1x128xf32, #tpu.memory_space<any>>
    %162 = tpu.memref_squeeze %161 : memref<1x128xf32, #tpu.memory_space<any>> -> memref<128xf32, #tpu.memory_space<any>>
    %c0_i32_65 = arith.constant 0 : i32
    %163 = tpu.memref_slice %arg5[%c0_i32_63, %c0_i32_65] : memref<16x128xf32, #tpu.memory_space<vmem>> -> memref<1x128xf32, #tpu.memory_space<vmem>>
    %164 = tpu.memref_squeeze %163 : memref<1x128xf32, #tpu.memory_space<vmem>> -> memref<128xf32, #tpu.memory_space<vmem>>
    %165 = tpu.memref_slice %arg6[%c0_i32_64] : memref<16x!tpu.dma_semaphore, #tpu.memory_space<semaphore_mem>> -> memref<1x!tpu.dma_semaphore, #tpu.memory_space<semaphore_mem>>
    %166 = tpu.memref_squeeze %165 : memref<1x!tpu.dma_semaphore, #tpu.memory_space<semaphore_mem>> -> memref<!tpu.dma_semaphore, #tpu.memory_space<semaphore_mem>>
    tpu.wait_dma2 semaphore(%166 : memref<!tpu.dma_semaphore, #tpu.memory_space<semaphore_mem>>) src(%162 : memref<128xf32, #tpu.memory_space<any>>) dst(%164 : memref<128xf32, #tpu.memory_space<vmem>>)
    %c1_i32_66 = arith.constant 1 : i32
    %c1_i32_67 = arith.constant 1 : i32
    %167 = tpu.memref_slice %arg3[%14, %0] : memref<64x128xf32, #tpu.memory_space<any>> -> memref<1x128xf32, #tpu.memory_space<any>>
    %168 = tpu.memref_squeeze %167 : memref<1x128xf32, #tpu.memory_space<any>> -> memref<128xf32, #tpu.memory_space<any>>
    %c0_i32_68 = arith.constant 0 : i32
    %169 = tpu.memref_slice %arg5[%c1_i32_66, %c0_i32_68] : memref<16x128xf32, #tpu.memory_space<vmem>> -> memref<1x128xf32, #tpu.memory_space<vmem>>
    %170 = tpu.memref_squeeze %169 : memref<1x128xf32, #tpu.memory_space<vmem>> -> memref<128xf32, #tpu.memory_space<vmem>>
    %171 = tpu.memref_slice %arg6[%c1_i32_67] : memref<16x!tpu.dma_semaphore, #tpu.memory_space<semaphore_mem>> -> memref<1x!tpu.dma_semaphore, #tpu.memory_space<semaphore_mem>>
    %172 = tpu.memref_squeeze %171 : memref<1x!tpu.dma_semaphore, #tpu.memory_space<semaphore_mem>> -> memref<!tpu.dma_semaphore, #tpu.memory_space<semaphore_mem>>
    tpu.wait_dma2 semaphore(%172 : memref<!tpu.dma_semaphore, #tpu.memory_space<semaphore_mem>>) src(%168 : memref<128xf32, #tpu.memory_space<any>>) dst(%170 : memref<128xf32, #tpu.memory_space<vmem>>)
    %c2_i32_69 = arith.constant 2 : i32
    %c2_i32_70 = arith.constant 2 : i32
    %173 = tpu.memref_slice %arg3[%24, %0] : memref<64x128xf32, #tpu.memory_space<any>> -> memref<1x128xf32, #tpu.memory_space<any>>
    %174 = tpu.memref_squeeze %173 : memref<1x128xf32, #tpu.memory_space<any>> -> memref<128xf32, #tpu.memory_space<any>>
    %c0_i32_71 = arith.constant 0 : i32
    %175 = tpu.memref_slice %arg5[%c2_i32_69, %c0_i32_71] : memref<16x128xf32, #tpu.memory_space<vmem>> -> memref<1x128xf32, #tpu.memory_space<vmem>>
    %176 = tpu.memref_squeeze %175 : memref<1x128xf32, #tpu.memory_space<vmem>> -> memref<128xf32, #tpu.memory_space<vmem>>
    %177 = tpu.memref_slice %arg6[%c2_i32_70] : memref<16x!tpu.dma_semaphore, #tpu.memory_space<semaphore_mem>> -> memref<1x!tpu.dma_semaphore, #tpu.memory_space<semaphore_mem>>
    %178 = tpu.memref_squeeze %177 : memref<1x!tpu.dma_semaphore, #tpu.memory_space<semaphore_mem>> -> memref<!tpu.dma_semaphore, #tpu.memory_space<semaphore_mem>>
    tpu.wait_dma2 semaphore(%178 : memref<!tpu.dma_semaphore, #tpu.memory_space<semaphore_mem>>) src(%174 : memref<128xf32, #tpu.memory_space<any>>) dst(%176 : memref<128xf32, #tpu.memory_space<vmem>>)
    %c3_i32_72 = arith.constant 3 : i32
    %c3_i32_73 = arith.constant 3 : i32
    %179 = tpu.memref_slice %arg3[%34, %0] : memref<64x128xf32, #tpu.memory_space<any>> -> memref<1x128xf32, #tpu.memory_space<any>>
    %180 = tpu.memref_squeeze %179 : memref<1x128xf32, #tpu.memory_space<any>> -> memref<128xf32, #tpu.memory_space<any>>
    %c0_i32_74 = arith.constant 0 : i32
    %181 = tpu.memref_slice %arg5[%c3_i32_72, %c0_i32_74] : memref<16x128xf32, #tpu.memory_space<vmem>> -> memref<1x128xf32, #tpu.memory_space<vmem>>
    %182 = tpu.memref_squeeze %181 : memref<1x128xf32, #tpu.memory_space<vmem>> -> memref<128xf32, #tpu.memory_space<vmem>>
    %183 = tpu.memref_slice %arg6[%c3_i32_73] : memref<16x!tpu.dma_semaphore, #tpu.memory_space<semaphore_mem>> -> memref<1x!tpu.dma_semaphore, #tpu.memory_space<semaphore_mem>>
    %184 = tpu.memref_squeeze %183 : memref<1x!tpu.dma_semaphore, #tpu.memory_space<semaphore_mem>> -> memref<!tpu.dma_semaphore, #tpu.memory_space<semaphore_mem>>
    tpu.wait_dma2 semaphore(%184 : memref<!tpu.dma_semaphore, #tpu.memory_space<semaphore_mem>>) src(%180 : memref<128xf32, #tpu.memory_space<any>>) dst(%182 : memref<128xf32, #tpu.memory_space<vmem>>)
    %c4_i32_75 = arith.constant 4 : i32
    %c4_i32_76 = arith.constant 4 : i32
    %185 = tpu.memref_slice %arg3[%44, %0] : memref<64x128xf32, #tpu.memory_space<any>> -> memref<1x128xf32, #tpu.memory_space<any>>
    %186 = tpu.memref_squeeze %185 : memref<1x128xf32, #tpu.memory_space<any>> -> memref<128xf32, #tpu.memory_space<any>>
    %c0_i32_77 = arith.constant 0 : i32
    %187 = tpu.memref_slice %arg5[%c4_i32_75, %c0_i32_77] : memref<16x128xf32, #tpu.memory_space<vmem>> -> memref<1x128xf32, #tpu.memory_space<vmem>>
    %188 = tpu.memref_squeeze %187 : memref<1x128xf32, #tpu.memory_space<vmem>> -> memref<128xf32, #tpu.memory_space<vmem>>
    %189 = tpu.memref_slice %arg6[%c4_i32_76] : memref<16x!tpu.dma_semaphore, #tpu.memory_space<semaphore_mem>> -> memref<1x!tpu.dma_semaphore, #tpu.memory_space<semaphore_mem>>
    %190 = tpu.memref_squeeze %189 : memref<1x!tpu.dma_semaphore, #tpu.memory_space<semaphore_mem>> -> memref<!tpu.dma_semaphore, #tpu.memory_space<semaphore_mem>>
    tpu.wait_dma2 semaphore(%190 : memref<!tpu.dma_semaphore, #tpu.memory_space<semaphore_mem>>) src(%186 : memref<128xf32, #tpu.memory_space<any>>) dst(%188 : memref<128xf32, #tpu.memory_space<vmem>>)
    %c5_i32_78 = arith.constant 5 : i32
    %c5_i32_79 = arith.constant 5 : i32
    %191 = tpu.memref_slice %arg3[%54, %0] : memref<64x128xf32, #tpu.memory_space<any>> -> memref<1x128xf32, #tpu.memory_space<any>>
    %192 = tpu.memref_squeeze %191 : memref<1x128xf32, #tpu.memory_space<any>> -> memref<128xf32, #tpu.memory_space<any>>
    %c0_i32_80 = arith.constant 0 : i32
    %193 = tpu.memref_slice %arg5[%c5_i32_78, %c0_i32_80] : memref<16x128xf32, #tpu.memory_space<vmem>> -> memref<1x128xf32, #tpu.memory_space<vmem>>
    %194 = tpu.memref_squeeze %193 : memref<1x128xf32, #tpu.memory_space<vmem>> -> memref<128xf32, #tpu.memory_space<vmem>>
    %195 = tpu.memref_slice %arg6[%c5_i32_79] : memref<16x!tpu.dma_semaphore, #tpu.memory_space<semaphore_mem>> -> memref<1x!tpu.dma_semaphore, #tpu.memory_space<semaphore_mem>>
    %196 = tpu.memref_squeeze %195 : memref<1x!tpu.dma_semaphore, #tpu.memory_space<semaphore_mem>> -> memref<!tpu.dma_semaphore, #tpu.memory_space<semaphore_mem>>
    tpu.wait_dma2 semaphore(%196 : memref<!tpu.dma_semaphore, #tpu.memory_space<semaphore_mem>>) src(%192 : memref<128xf32, #tpu.memory_space<any>>) dst(%194 : memref<128xf32, #tpu.memory_space<vmem>>)
    %c6_i32_81 = arith.constant 6 : i32
    %c6_i32_82 = arith.constant 6 : i32
    %197 = tpu.memref_slice %arg3[%64, %0] : memref<64x128xf32, #tpu.memory_space<any>> -> memref<1x128xf32, #tpu.memory_space<any>>
    %198 = tpu.memref_squeeze %197 : memref<1x128xf32, #tpu.memory_space<any>> -> memref<128xf32, #tpu.memory_space<any>>
    %c0_i32_83 = arith.constant 0 : i32
    %199 = tpu.memref_slice %arg5[%c6_i32_81, %c0_i32_83] : memref<16x128xf32, #tpu.memory_space<vmem>> -> memref<1x128xf32, #tpu.memory_space<vmem>>
    %200 = tpu.memref_squeeze %199 : memref<1x128xf32, #tpu.memory_space<vmem>> -> memref<128xf32, #tpu.memory_space<vmem>>
    %201 = tpu.memref_slice %arg6[%c6_i32_82] : memref<16x!tpu.dma_semaphore, #tpu.memory_space<semaphore_mem>> -> memref<1x!tpu.dma_semaphore, #tpu.memory_space<semaphore_mem>>
    %202 = tpu.memref_squeeze %201 : memref<1x!tpu.dma_semaphore, #tpu.memory_space<semaphore_mem>> -> memref<!tpu.dma_semaphore, #tpu.memory_space<semaphore_mem>>
    tpu.wait_dma2 semaphore(%202 : memref<!tpu.dma_semaphore, #tpu.memory_space<semaphore_mem>>) src(%198 : memref<128xf32, #tpu.memory_space<any>>) dst(%200 : memref<128xf32, #tpu.memory_space<vmem>>)
    %c7_i32_84 = arith.constant 7 : i32
    %c7_i32_85 = arith.constant 7 : i32
    %203 = tpu.memref_slice %arg3[%74, %0] : memref<64x128xf32, #tpu.memory_space<any>> -> memref<1x128xf32, #tpu.memory_space<any>>
    %204 = tpu.memref_squeeze %203 : memref<1x128xf32, #tpu.memory_space<any>> -> memref<128xf32, #tpu.memory_space<any>>
    %c0_i32_86 = arith.constant 0 : i32
    %205 = tpu.memref_slice %arg5[%c7_i32_84, %c0_i32_86] : memref<16x128xf32, #tpu.memory_space<vmem>> -> memref<1x128xf32, #tpu.memory_space<vmem>>
    %206 = tpu.memref_squeeze %205 : memref<1x128xf32, #tpu.memory_space<vmem>> -> memref<128xf32, #tpu.memory_space<vmem>>
    %207 = tpu.memref_slice %arg6[%c7_i32_85] : memref<16x!tpu.dma_semaphore, #tpu.memory_space<semaphore_mem>> -> memref<1x!tpu.dma_semaphore, #tpu.memory_space<semaphore_mem>>
    %208 = tpu.memref_squeeze %207 : memref<1x!tpu.dma_semaphore, #tpu.memory_space<semaphore_mem>> -> memref<!tpu.dma_semaphore, #tpu.memory_space<semaphore_mem>>
    tpu.wait_dma2 semaphore(%208 : memref<!tpu.dma_semaphore, #tpu.memory_space<semaphore_mem>>) src(%204 : memref<128xf32, #tpu.memory_space<any>>) dst(%206 : memref<128xf32, #tpu.memory_space<vmem>>)
    %c8_i32_87 = arith.constant 8 : i32
    %c8_i32_88 = arith.constant 8 : i32
    %209 = tpu.memref_slice %arg3[%84, %0] : memref<64x128xf32, #tpu.memory_space<any>> -> memref<1x128xf32, #tpu.memory_space<any>>
    %210 = tpu.memref_squeeze %209 : memref<1x128xf32, #tpu.memory_space<any>> -> memref<128xf32, #tpu.memory_space<any>>
    %c0_i32_89 = arith.constant 0 : i32
    %211 = tpu.memref_slice %arg5[%c8_i32_87, %c0_i32_89] : memref<16x128xf32, #tpu.memory_space<vmem>> -> memref<1x128xf32, #tpu.memory_space<vmem>>
    %212 = tpu.memref_squeeze %211 : memref<1x128xf32, #tpu.memory_space<vmem>> -> memref<128xf32, #tpu.memory_space<vmem>>
    %213 = tpu.memref_slice %arg6[%c8_i32_88] : memref<16x!tpu.dma_semaphore, #tpu.memory_space<semaphore_mem>> -> memref<1x!tpu.dma_semaphore, #tpu.memory_space<semaphore_mem>>
    %214 = tpu.memref_squeeze %213 : memref<1x!tpu.dma_semaphore, #tpu.memory_space<semaphore_mem>> -> memref<!tpu.dma_semaphore, #tpu.memory_space<semaphore_mem>>
    tpu.wait_dma2 semaphore(%214 : memref<!tpu.dma_semaphore, #tpu.memory_space<semaphore_mem>>) src(%210 : memref<128xf32, #tpu.memory_space<any>>) dst(%212 : memref<128xf32, #tpu.memory_space<vmem>>)
    %c9_i32_90 = arith.constant 9 : i32
    %c9_i32_91 = arith.constant 9 : i32
    %215 = tpu.memref_slice %arg3[%94, %0] : memref<64x128xf32, #tpu.memory_space<any>> -> memref<1x128xf32, #tpu.memory_space<any>>
    %216 = tpu.memref_squeeze %215 : memref<1x128xf32, #tpu.memory_space<any>> -> memref<128xf32, #tpu.memory_space<any>>
    %c0_i32_92 = arith.constant 0 : i32
    %217 = tpu.memref_slice %arg5[%c9_i32_90, %c0_i32_92] : memref<16x128xf32, #tpu.memory_space<vmem>> -> memref<1x128xf32, #tpu.memory_space<vmem>>
    %218 = tpu.memref_squeeze %217 : memref<1x128xf32, #tpu.memory_space<vmem>> -> memref<128xf32, #tpu.memory_space<vmem>>
    %219 = tpu.memref_slice %arg6[%c9_i32_91] : memref<16x!tpu.dma_semaphore, #tpu.memory_space<semaphore_mem>> -> memref<1x!tpu.dma_semaphore, #tpu.memory_space<semaphore_mem>>
    %220 = tpu.memref_squeeze %219 : memref<1x!tpu.dma_semaphore, #tpu.memory_space<semaphore_mem>> -> memref<!tpu.dma_semaphore, #tpu.memory_space<semaphore_mem>>
    tpu.wait_dma2 semaphore(%220 : memref<!tpu.dma_semaphore, #tpu.memory_space<semaphore_mem>>) src(%216 : memref<128xf32, #tpu.memory_space<any>>) dst(%218 : memref<128xf32, #tpu.memory_space<vmem>>)
    %c10_i32_93 = arith.constant 10 : i32
    %c10_i32_94 = arith.constant 10 : i32
    %221 = tpu.memref_slice %arg3[%104, %0] : memref<64x128xf32, #tpu.memory_space<any>> -> memref<1x128xf32, #tpu.memory_space<any>>
    %222 = tpu.memref_squeeze %221 : memref<1x128xf32, #tpu.memory_space<any>> -> memref<128xf32, #tpu.memory_space<any>>
    %c0_i32_95 = arith.constant 0 : i32
    %223 = tpu.memref_slice %arg5[%c10_i32_93, %c0_i32_95] : memref<16x128xf32, #tpu.memory_space<vmem>> -> memref<1x128xf32, #tpu.memory_space<vmem>>
    %224 = tpu.memref_squeeze %223 : memref<1x128xf32, #tpu.memory_space<vmem>> -> memref<128xf32, #tpu.memory_space<vmem>>
    %225 = tpu.memref_slice %arg6[%c10_i32_94] : memref<16x!tpu.dma_semaphore, #tpu.memory_space<semaphore_mem>> -> memref<1x!tpu.dma_semaphore, #tpu.memory_space<semaphore_mem>>
    %226 = tpu.memref_squeeze %225 : memref<1x!tpu.dma_semaphore, #tpu.memory_space<semaphore_mem>> -> memref<!tpu.dma_semaphore, #tpu.memory_space<semaphore_mem>>
    tpu.wait_dma2 semaphore(%226 : memref<!tpu.dma_semaphore, #tpu.memory_space<semaphore_mem>>) src(%222 : memref<128xf32, #tpu.memory_space<any>>) dst(%224 : memref<128xf32, #tpu.memory_space<vmem>>)
    %c11_i32_96 = arith.constant 11 : i32
    %c11_i32_97 = arith.constant 11 : i32
    %227 = tpu.memref_slice %arg3[%114, %0] : memref<64x128xf32, #tpu.memory_space<any>> -> memref<1x128xf32, #tpu.memory_space<any>>
    %228 = tpu.memref_squeeze %227 : memref<1x128xf32, #tpu.memory_space<any>> -> memref<128xf32, #tpu.memory_space<any>>
    %c0_i32_98 = arith.constant 0 : i32
    %229 = tpu.memref_slice %arg5[%c11_i32_96, %c0_i32_98] : memref<16x128xf32, #tpu.memory_space<vmem>> -> memref<1x128xf32, #tpu.memory_space<vmem>>
    %230 = tpu.memref_squeeze %229 : memref<1x128xf32, #tpu.memory_space<vmem>> -> memref<128xf32, #tpu.memory_space<vmem>>
    %231 = tpu.memref_slice %arg6[%c11_i32_97] : memref<16x!tpu.dma_semaphore, #tpu.memory_space<semaphore_mem>> -> memref<1x!tpu.dma_semaphore, #tpu.memory_space<semaphore_mem>>
    %232 = tpu.memref_squeeze %231 : memref<1x!tpu.dma_semaphore, #tpu.memory_space<semaphore_mem>> -> memref<!tpu.dma_semaphore, #tpu.memory_space<semaphore_mem>>
    tpu.wait_dma2 semaphore(%232 : memref<!tpu.dma_semaphore, #tpu.memory_space<semaphore_mem>>) src(%228 : memref<128xf32, #tpu.memory_space<any>>) dst(%230 : memref<128xf32, #tpu.memory_space<vmem>>)
    %c12_i32_99 = arith.constant 12 : i32
    %c12_i32_100 = arith.constant 12 : i32
    %233 = tpu.memref_slice %arg3[%124, %0] : memref<64x128xf32, #tpu.memory_space<any>> -> memref<1x128xf32, #tpu.memory_space<any>>
    %234 = tpu.memref_squeeze %233 : memref<1x128xf32, #tpu.memory_space<any>> -> memref<128xf32, #tpu.memory_space<any>>
    %c0_i32_101 = arith.constant 0 : i32
    %235 = tpu.memref_slice %arg5[%c12_i32_99, %c0_i32_101] : memref<16x128xf32, #tpu.memory_space<vmem>> -> memref<1x128xf32, #tpu.memory_space<vmem>>
    %236 = tpu.memref_squeeze %235 : memref<1x128xf32, #tpu.memory_space<vmem>> -> memref<128xf32, #tpu.memory_space<vmem>>
    %237 = tpu.memref_slice %arg6[%c12_i32_100] : memref<16x!tpu.dma_semaphore, #tpu.memory_space<semaphore_mem>> -> memref<1x!tpu.dma_semaphore, #tpu.memory_space<semaphore_mem>>
    %238 = tpu.memref_squeeze %237 : memref<1x!tpu.dma_semaphore, #tpu.memory_space<semaphore_mem>> -> memref<!tpu.dma_semaphore, #tpu.memory_space<semaphore_mem>>
    tpu.wait_dma2 semaphore(%238 : memref<!tpu.dma_semaphore, #tpu.memory_space<semaphore_mem>>) src(%234 : memref<128xf32, #tpu.memory_space<any>>) dst(%236 : memref<128xf32, #tpu.memory_space<vmem>>)
    %c13_i32_102 = arith.constant 13 : i32
    %c13_i32_103 = arith.constant 13 : i32
    %239 = tpu.memref_slice %arg3[%134, %0] : memref<64x128xf32, #tpu.memory_space<any>> -> memref<1x128xf32, #tpu.memory_space<any>>
    %240 = tpu.memref_squeeze %239 : memref<1x128xf32, #tpu.memory_space<any>> -> memref<128xf32, #tpu.memory_space<any>>
    %c0_i32_104 = arith.constant 0 : i32
    %241 = tpu.memref_slice %arg5[%c13_i32_102, %c0_i32_104] : memref<16x128xf32, #tpu.memory_space<vmem>> -> memref<1x128xf32, #tpu.memory_space<vmem>>
    %242 = tpu.memref_squeeze %241 : memref<1x128xf32, #tpu.memory_space<vmem>> -> memref<128xf32, #tpu.memory_space<vmem>>
    %243 = tpu.memref_slice %arg6[%c13_i32_103] : memref<16x!tpu.dma_semaphore, #tpu.memory_space<semaphore_mem>> -> memref<1x!tpu.dma_semaphore, #tpu.memory_space<semaphore_mem>>
    %244 = tpu.memref_squeeze %243 : memref<1x!tpu.dma_semaphore, #tpu.memory_space<semaphore_mem>> -> memref<!tpu.dma_semaphore, #tpu.memory_space<semaphore_mem>>
    tpu.wait_dma2 semaphore(%244 : memref<!tpu.dma_semaphore, #tpu.memory_space<semaphore_mem>>) src(%240 : memref<128xf32, #tpu.memory_space<any>>) dst(%242 : memref<128xf32, #tpu.memory_space<vmem>>)
    %c14_i32_105 = arith.constant 14 : i32
    %c14_i32_106 = arith.constant 14 : i32
    %245 = tpu.memref_slice %arg3[%144, %0] : memref<64x128xf32, #tpu.memory_space<any>> -> memref<1x128xf32, #tpu.memory_space<any>>
    %246 = tpu.memref_squeeze %245 : memref<1x128xf32, #tpu.memory_space<any>> -> memref<128xf32, #tpu.memory_space<any>>
    %c0_i32_107 = arith.constant 0 : i32
    %247 = tpu.memref_slice %arg5[%c14_i32_105, %c0_i32_107] : memref<16x128xf32, #tpu.memory_space<vmem>> -> memref<1x128xf32, #tpu.memory_space<vmem>>
    %248 = tpu.memref_squeeze %247 : memref<1x128xf32, #tpu.memory_space<vmem>> -> memref<128xf32, #tpu.memory_space<vmem>>
    %249 = tpu.memref_slice %arg6[%c14_i32_106] : memref<16x!tpu.dma_semaphore, #tpu.memory_space<semaphore_mem>> -> memref<1x!tpu.dma_semaphore, #tpu.memory_space<semaphore_mem>>
    %250 = tpu.memref_squeeze %249 : memref<1x!tpu.dma_semaphore, #tpu.memory_space<semaphore_mem>> -> memref<!tpu.dma_semaphore, #tpu.memory_space<semaphore_mem>>
    tpu.wait_dma2 semaphore(%250 : memref<!tpu.dma_semaphore, #tpu.memory_space<semaphore_mem>>) src(%246 : memref<128xf32, #tpu.memory_space<any>>) dst(%248 : memref<128xf32, #tpu.memory_space<vmem>>)
    %c15_i32_108 = arith.constant 15 : i32
    %c15_i32_109 = arith.constant 15 : i32
    %251 = tpu.memref_slice %arg3[%154, %0] : memref<64x128xf32, #tpu.memory_space<any>> -> memref<1x128xf32, #tpu.memory_space<any>>
    %252 = tpu.memref_squeeze %251 : memref<1x128xf32, #tpu.memory_space<any>> -> memref<128xf32, #tpu.memory_space<any>>
    %c0_i32_110 = arith.constant 0 : i32
    %253 = tpu.memref_slice %arg5[%c15_i32_108, %c0_i32_110] : memref<16x128xf32, #tpu.memory_space<vmem>> -> memref<1x128xf32, #tpu.memory_space<vmem>>
    %254 = tpu.memref_squeeze %253 : memref<1x128xf32, #tpu.memory_space<vmem>> -> memref<128xf32, #tpu.memory_space<vmem>>
    %255 = tpu.memref_slice %arg6[%c15_i32_109] : memref<16x!tpu.dma_semaphore, #tpu.memory_space<semaphore_mem>> -> memref<1x!tpu.dma_semaphore, #tpu.memory_space<semaphore_mem>>
    %256 = tpu.memref_squeeze %255 : memref<1x!tpu.dma_semaphore, #tpu.memory_space<semaphore_mem>> -> memref<!tpu.dma_semaphore, #tpu.memory_space<semaphore_mem>>
    tpu.wait_dma2 semaphore(%256 : memref<!tpu.dma_semaphore, #tpu.memory_space<semaphore_mem>>) src(%252 : memref<128xf32, #tpu.memory_space<any>>) dst(%254 : memref<128xf32, #tpu.memory_space<vmem>>)
    %c0 = arith.constant 0 : index
    %c0_111 = arith.constant 0 : index
    %257 = vector.load %arg5[%c0, %c0_111] : memref<16x128xf32, #tpu.memory_space<vmem>>, vector<16x128xf32>
    %c0_112 = arith.constant 0 : index
    %c0_113 = arith.constant 0 : index
    %258 = vector.load %arg4[%c0_112, %c0_113] : memref<16x128xf32, #tpu.memory_space<vmem>>, vector<16x128xf32>
    tpu.vector_store %arg4[%c0_112, %c0_113], %257 {strides = array<i32>} : memref<16x128xf32, #tpu.memory_space<vmem>>, vector<16x128xf32>,
    return
  }
  func.func @transform_1(%arg0: i32, %arg1: i32, %arg2: memref<16xi32, #tpu.memory_space<smem>>) -> (i32, i32) {
    %c0_i32 = arith.constant 0 : i32
    return %arg0, %arg1 : i32, i32
  }
}

</mosaic_0001>

<bundles_post_ra>
// kernel: tpu_custom_call.1
= control target key start
LH: loop header
LB: loop body
LE: loop exit
PB: predicated region body
PF: predicated region fallthrough
CT: control target
= control target key end

     0   :  { %s1353_s0 = inlined_call_operand.hbm [shape: s32[16], index: 0, kind: input, shape index: {}]   ;;  %s1354_s1 = inlined_call_operand.hbm [shape: f32[64,128], index: 1, kind: input, shape index: {}]   ;;  %s1355_s2 = inlined_call_operand.hbm [shape: f32[16,128], index: 2, kind: output, shape index: {}]  }
   0x1   :  { %s579_s11 = scalar_lea.hbm %s1353_s0, 16 }
   0x2   :  { %p580_p0 = scmp.ne.s32.totalorder %s1353_s0, %s579_s11  ;;  %p583_p1 = scmp.lt.u32.totalorder %s579_s11, %s1353_s0 }
   0x4   :  { %p585_p2 = pnand %p583_p1, %p580_p0 }
   0x6   :  { %588 = shalt.err (!%p585_p2)  }
   0x7   :  { %s1031_s16 = smov [#allocation5]  }
   0x8   :  { %8 = dma.hbm_to_smem %s1353_s0, 16, %s1031_s16, [#allocation4] }
   0x9   :  { %995 = dma.done.wait [#allocation4], 16 }
   0xa   :  { %996 = vsyncadd [#allocation4], 4294967280 }
   0xb   :  { %10 = sfence }
   0xc   :  { %11 = vsyncpa [#allocation7], 0  ;;  %s14_s19 = sld [smem:[#allocation5]]  ;;  %s1032_s20 = smov [#allocation2]  }
   0xd   :  { %s27_s21 = sshll.u32 %s1032_s20, 4  ;;  %s1078_s22 = sld [smem:[#allocation5 + $0x1]]  ;;  %s1080_s21 = int_to_ptr.vmem [resolvable:$true] %s27_s21 }
   0xe   :  { %s1033_s23 = smov [#allocation2 + $0x1]   ;;  %s1082_s25 = sld [smem:[#allocation5 + $0x2]] }
   0xf   :  { %s45_s24 = sshll.u32 %s1033_s23, 4  ;;  %s1034_s26 = smov [#allocation2 + $0x2]   ;;  %s1084_s24 = int_to_ptr.vmem [resolvable:$true] %s45_s24 }
  0x10   :  { %s63_s0 = sshll.u32 %s1034_s26, 4  ;;  %s1086_s27 = sld [smem:[#allocation5 + $0x3]]  ;;  %s1088_s0 = int_to_ptr.vmem [resolvable:$true] %s63_s0 }
  0x11   :  { %s1097_s8 = scalar_lea.hbm %s1354_s1, 1024 }
  0x12   :  { %s512_s28 = sshll.u32 %s14_s19, 4 }
  0x13   :  { %s19_s3 = scalar_lea.hbm %s1354_s1, %s512_s28  ;;  %s514_s4 = sshll.u32 %s1078_s22, 4 }
  0x14   :  { %s589_s5 = scalar_lea.hbm %s19_s3, 16  ;;  %p592_p4 = scmp.lt.u32.totalorder %s19_s3, %s1354_s1 }
  0x15   :  { %p590_p3 = scmp.ne.s32.totalorder %s19_s3, %s589_s5  ;;  %p593_p5 = scmp.lt.u32.totalorder %s1097_s8, %s589_s5 }
  0x16   :  { %p595_p7 = scmp.lt.u32.totalorder %s589_s5, %s19_s3 }
  0x17   :  { %p594_p6 = por %p593_p5, %p592_p4 }
  0x19   :  { %p596_p8 = por %p595_p7, %p594_p6 }
  0x1b   :  { %p597_p9 = pnand %p596_p8, %p590_p3 }
  0x1d   :  { %600 = shalt.err (!%p597_p9)  }
  0x1e   :  { %s601_s11 = scalar_lea.vmem %s1080_s21, 16  ;;  %s1106_s12 = scalar_lea.vmem %s1080_s21, 256 }
  0x1f   :  { %p602_p10 = scmp.ne.s32.totalorder %s1080_s21, %s601_s11  ;;  %p606_p11 = scmp.lt.s32.totalorder %s1080_s21, %s1080_s21 }
  0x20   :  { %p607_p12 = scmp.lt.s32.totalorder %s1106_s12, %s601_s11 }
  0x22   :  { %p608_p13 = por %p607_p12, %p606_p11 }
  0x24   :  { %p609_p0 = pnand %p608_p13, %p602_p10 }
  0x26   :  { %612 = shalt.err (!%p609_p0)  }
  0x27   :  { %30 = dma.hbm_to_vmem [thread:$0]  %s19_s3, 16, %s1080_s21, [#allocation3] }
  0x28   :  { %s35_s15 = scalar_lea.hbm %s1354_s1, %s514_s4  ;;  %s516_s16 = sshll.u32 %s1082_s25, 4 }
  0x29   :  { %s613_s17 = scalar_lea.hbm %s35_s15, 16  ;;  %p616_p2 = scmp.lt.u32.totalorder %s35_s15, %s1354_s1 }
  0x2a   :  { %p614_p1 = scmp.ne.s32.totalorder %s35_s15, %s613_s17  ;;  %p617_p3 = scmp.lt.u32.totalorder %s1097_s8, %s613_s17 }
  0x2b   :  { %p619_p5 = scmp.lt.u32.totalorder %s613_s17, %s35_s15 }
  0x2c   :  { %p618_p4 = por %p617_p3, %p616_p2 }
  0x2e   :  { %p620_p6 = por %p619_p5, %p618_p4 }
  0x30   :  { %p621_p7 = pnand %p620_p6, %p614_p1 }
  0x32   :  { %624 = shalt.err (!%p621_p7)  }
  0x33   :  { %s625_s20 = scalar_lea.vmem %s1084_s24, 16  ;;  %p630_p9 = scmp.lt.s32.totalorder %s1084_s24, %s1080_s21 }
  0x34   :  { %p626_p8 = scmp.ne.s32.totalorder %s1084_s24, %s625_s20  ;;  %p631_p10 = scmp.lt.s32.totalorder %s1106_s12, %s625_s20 }
  0x36   :  { %p632_p11 = por %p631_p10, %p630_p9 }
  0x38   :  { %p633_p12 = pnand %p632_p11, %p626_p8 }
  0x3a   :  { %636 = shalt.err (!%p633_p12)  }
  0x3b   :  { %48 = dma.hbm_to_vmem [thread:$0]  %s35_s15, 16, %s1084_s24, [#allocation3 + $0x1] }
  0x3c   :  { %s53_s25 = scalar_lea.hbm %s1354_s1, %s516_s16  ;;  %s518_s26 = sshll.u32 %s1086_s27, 4 }
  0x3d   :  { %s637_s28 = scalar_lea.hbm %s53_s25, 16  ;;  %p640_p0 = scmp.lt.u32.totalorder %s53_s25, %s1354_s1 }
  0x3e   :  { %p638_p13 = scmp.ne.s32.totalorder %s53_s25, %s637_s28  ;;  %p641_p1 = scmp.lt.u32.totalorder %s1097_s8, %s637_s28 }
  0x3f   :  { %p643_p3 = scmp.lt.u32.totalorder %s637_s28, %s53_s25 }
  0x40   :  { %p642_p2 = por %p641_p1, %p640_p0 }
  0x42   :  { %p644_p4 = por %p643_p3, %p642_p2 }
  0x44   :  { %p645_p5 = pnand %p644_p4, %p638_p13 }
  0x46   :  { %648 = shalt.err (!%p645_p5)  }
  0x47   :  { %s649_s24 = scalar_lea.vmem %s1088_s0, 16  ;;  %p654_p7 = scmp.lt.s32.totalorder %s1088_s0, %s1080_s21 }
  0x48   :  { %p650_p6 = scmp.ne.s32.totalorder %s1088_s0, %s649_s24  ;;  %p655_p8 = scmp.lt.s32.totalorder %s1106_s12, %s649_s24 }
  0x4a   :  { %p656_p9 = por %p655_p8, %p654_p7 }
  0x4c   :  { %p657_p10 = pnand %p656_p9, %p650_p6 }
  0x4e   :  { %660 = shalt.err (!%p657_p10)  }
  0x4f   :  { %66 = dma.hbm_to_vmem [thread:$0]  %s53_s25, 16, %s1088_s0, [#allocation3 + $0x2] }
  0x50   :  { %s71_s4 = scalar_lea.hbm %s1354_s1, %s518_s26  ;;  %s1035_s5 = smov [#allocation2 + $0x3]  }
  0x51   :  { %s81_s6 = sshll.u32 %s1035_s5, 4  ;;  %s1143_s7 = sld [smem:[#allocation5 + $0x4]]  ;;  %s82_s6 = int_to_ptr.vmem [resolvable:$true] %s81_s6 }
  0x52   :  { %s661_s9 = scalar_lea.hbm %s71_s4, 16  ;;  %p664_p12 = scmp.lt.u32.totalorder %s71_s4, %s1354_s1 }
  0x53   :  { %p662_p11 = scmp.ne.s32.totalorder %s71_s4, %s661_s9  ;;  %p665_p13 = scmp.lt.u32.totalorder %s1097_s8, %s661_s9 }
  0x54   :  { %p667_p1 = scmp.lt.u32.totalorder %s661_s9, %s71_s4 }
  0x55   :  { %p666_p0 = por %p665_p13, %p664_p12 }
  0x57   :  { %p668_p2 = por %p667_p1, %p666_p0 }
  0x59   :  { %p669_p3 = pnand %p668_p2, %p662_p11 }
  0x5b   :  { %672 = shalt.err (!%p669_p3)  }
  0x5c   :  { %s673_s0 = scalar_lea.vmem %s82_s6, 16  ;;  %p678_p5 = scmp.lt.s32.totalorder %s82_s6, %s1080_s21 }
  0x5d   :  { %p674_p4 = scmp.ne.s32.totalorder %s82_s6, %s673_s0  ;;  %p679_p6 = scmp.lt.s32.totalorder %s1106_s12, %s673_s0 }
  0x5f   :  { %p680_p7 = por %p679_p6, %p678_p5 }
  0x61   :  { %p681_p8 = pnand %p680_p7, %p674_p4 }
  0x63   :  { %684 = shalt.err (!%p681_p8)  }
  0x64   :  { %84 = dma.hbm_to_vmem [thread:$0]  %s71_s4, 16, %s82_s6, [#allocation3 + $0x3] }
  0x65   :  { %s1036_s13 = smov [#allocation2 + $0x4]   ;;  %s1151_s15 = sld [smem:[#allocation5 + $0x5]] }
  0x66   :  { %s99_s14 = sshll.u32 %s1036_s13, 4  ;;  %s1037_s16 = smov [#allocation2 + $0x5]   ;;  %s100_s14 = int_to_ptr.vmem [resolvable:$true] %s99_s14 }
  0x67   :  { %s117_s17 = sshll.u32 %s1037_s16, 4  ;;  %s1153_s18 = sld [smem:[#allocation5 + $0x6]]  ;;  %s1156_s17 = int_to_ptr.vmem [resolvable:$true] %s117_s17 }
  0x68   :  { %s520_s19 = sshll.u32 %s1143_s7, 4 }
  0x69   :  { %s89_s23 = scalar_lea.hbm %s1354_s1, %s520_s19 }
  0x6a   :  { %s685_s25 = scalar_lea.hbm %s89_s23, 16  ;;  %p688_p10 = scmp.lt.u32.totalorder %s89_s23, %s1354_s1 }
  0x6b   :  { %p686_p9 = scmp.ne.s32.totalorder %s89_s23, %s685_s25  ;;  %p689_p11 = scmp.lt.u32.totalorder %s1097_s8, %s685_s25 }
  0x6c   :  { %p691_p13 = scmp.lt.u32.totalorder %s685_s25, %s89_s23 }
  0x6d   :  { %p690_p12 = por %p689_p11, %p688_p10 }
  0x6f   :  { %p692_p0 = por %p691_p13, %p690_p12 }
  0x71   :  { %p693_p1 = pnand %p692_p0, %p686_p9 }
  0x73   :  { %696 = shalt.err (!%p693_p1)  }
  0x74   :  { %s697_s29 = scalar_lea.vmem %s100_s14, 16  ;;  %p702_p3 = scmp.lt.s32.totalorder %s100_s14, %s1080_s21 }
  0x75   :  { %p698_p2 = scmp.ne.s32.totalorder %s100_s14, %s697_s29  ;;  %p703_p4 = scmp.lt.s32.totalorder %s1106_s12, %s697_s29 }
  0x77   :  { %p704_p5 = por %p703_p4, %p702_p3 }
  0x79   :  { %p705_p6 = pnand %p704_p5, %p698_p2 }
  0x7b   :  { %708 = shalt.err (!%p705_p6)  }
  0x7c   :  { %102 = dma.hbm_to_vmem [thread:$0]  %s89_s23, 16, %s100_s14, [#allocation3 + $0x4] }
  0x7d   :  { %s522_s30 = sshll.u32 %s1151_s15, 4  ;;  %s1038_s24 = smov [#allocation2 + $0x6]  }
  0x7e   :  { %s135_s27 = sshll.u32 %s1038_s24, 4  ;;  %s107_s5 = scalar_lea.hbm %s1354_s1, %s522_s30  ;;  %s1171_s27 = int_to_ptr.vmem [resolvable:$true] %s135_s27 }
  0x7f   :  { %s709_s6 = scalar_lea.hbm %s107_s5, 16  ;;  %p712_p8 = scmp.lt.u32.totalorder %s107_s5, %s1354_s1 }
  0x80   :  { %p710_p7 = scmp.ne.s32.totalorder %s107_s5, %s709_s6  ;;  %p713_p9 = scmp.lt.u32.totalorder %s1097_s8, %s709_s6 }
  0x81   :  { %p715_p11 = scmp.lt.u32.totalorder %s709_s6, %s107_s5 }
  0x82   :  { %p714_p10 = por %p713_p9, %p712_p8 }
  0x84   :  { %p716_p12 = por %p715_p11, %p714_p10 }
  0x86   :  { %p717_p13 = pnand %p716_p12, %p710_p7 }
  0x88   :  { %720 = shalt.err (!%p717_p13)  }
  0x89   :  { %s721_s10 = scalar_lea.vmem %s1156_s17, 16  ;;  %p726_p1 = scmp.lt.s32.totalorder %s1156_s17, %s1080_s21 }
  0x8a   :  { %p722_p0 = scmp.ne.s32.totalorder %s1156_s17, %s721_s10  ;;  %p727_p2 = scmp.lt.s32.totalorder %s1106_s12, %s721_s10 }
  0x8c   :  { %p728_p3 = por %p727_p2, %p726_p1 }
  0x8e   :  { %p729_p4 = pnand %p728_p3, %p722_p0 }
  0x90   :  { %732 = shalt.err (!%p729_p4)  }
  0x91   :  { %120 = dma.hbm_to_vmem [thread:$0]  %s107_s5, 16, %s1156_s17, [#allocation3 + $0x5] }
  0x92   :  { %s524_s11 = sshll.u32 %s1153_s18, 4  ;;  %s1184_s0 = sld [smem:[#allocation5 + $0x7]] }
  0x93   :  { %s125_s15 = scalar_lea.hbm %s1354_s1, %s524_s11 }
  0x94   :  { %s733_s16 = scalar_lea.hbm %s125_s15, 16  ;;  %p736_p6 = scmp.lt.u32.totalorder %s125_s15, %s1354_s1 }
  0x95   :  { %p734_p5 = scmp.ne.s32.totalorder %s125_s15, %s733_s16  ;;  %p737_p7 = scmp.lt.u32.totalorder %s1097_s8, %s733_s16 }
  0x96   :  { %p739_p9 = scmp.lt.u32.totalorder %s733_s16, %s125_s15 }
  0x97   :  { %p738_p8 = por %p737_p7, %p736_p6 }
  0x99   :  { %p740_p10 = por %p739_p9, %p738_p8 }
  0x9b   :  { %p741_p11 = pnand %p740_p10, %p734_p5 }
  0x9d   :  { %744 = shalt.err (!%p741_p11)  }
  0x9e   :  { %s745_s17 = scalar_lea.vmem %s1171_s27, 16  ;;  %p750_p13 = scmp.lt.s32.totalorder %s1171_s27, %s1080_s21 }
  0x9f   :  { %p746_p12 = scmp.ne.s32.totalorder %s1171_s27, %s745_s17  ;;  %p751_p0 = scmp.lt.s32.totalorder %s1106_s12, %s745_s17 }
  0xa1   :  { %p752_p1 = por %p751_p0, %p750_p13 }
  0xa3   :  { %p753_p2 = pnand %p752_p1, %p746_p12 }
  0xa5   :  { %756 = shalt.err (!%p753_p2)  }
  0xa6   :  { %138 = dma.hbm_to_vmem [thread:$0]  %s125_s15, 16, %s1171_s27, [#allocation3 + $0x6] }
  0xa7   :  { %s1039_s18 = smov [#allocation2 + $0x7]   ;;  %s1199_s23 = sld [smem:[#allocation5 + $0x8]] }
  0xa8   :  { %s153_s22 = sshll.u32 %s1039_s18, 4  ;;  %s1040_s25 = smov [#allocation2 + $0x8]   ;;  %s154_s22 = int_to_ptr.vmem [resolvable:$true] %s153_s22 }
  0xa9   :  { %s171_s26 = sshll.u32 %s1040_s25, 4  ;;  %s1201_s28 = sld [smem:[#allocation5 + $0x9]]  ;;  %s1204_s26 = int_to_ptr.vmem [resolvable:$true] %s171_s26 }
  0xaa   :  { %s526_s29 = sshll.u32 %s1184_s0, 4 }
  0xab   :  { %s143_s3 = scalar_lea.hbm %s1354_s1, %s526_s29 }
  0xac   :  { %s757_s4 = scalar_lea.hbm %s143_s3, 16  ;;  %p760_p4 = scmp.lt.u32.totalorder %s143_s3, %s1354_s1 }
  0xad   :  { %p758_p3 = scmp.ne.s32.totalorder %s143_s3, %s757_s4  ;;  %p761_p5 = scmp.lt.u32.totalorder %s1097_s8, %s757_s4 }
  0xae   :  { %p763_p7 = scmp.lt.u32.totalorder %s757_s4, %s143_s3 }
  0xaf   :  { %p762_p6 = por %p761_p5, %p760_p4 }
  0xb1   :  { %p764_p8 = por %p763_p7, %p762_p6 }
  0xb3   :  { %p765_p9 = pnand %p764_p8, %p758_p3 }
  0xb5   :  { %768 = shalt.err (!%p765_p9)  }
  0xb6   :  { %s769_s6 = scalar_lea.vmem %s154_s22, 16  ;;  %p774_p11 = scmp.lt.s32.totalorder %s154_s22, %s1080_s21 }
  0xb7   :  { %p770_p10 = scmp.ne.s32.totalorder %s154_s22, %s769_s6  ;;  %p775_p12 = scmp.lt.s32.totalorder %s1106_s12, %s769_s6 }
  0xb9   :  { %p776_p13 = por %p775_p12, %p774_p11 }
  0xbb   :  { %p777_p0 = pnand %p776_p13, %p770_p10 }
  0xbd   :  { %780 = shalt.err (!%p777_p0)  }
  0xbe   :  { %156 = dma.hbm_to_vmem [thread:$0]  %s143_s3, 16, %s154_s22, [#allocation3 + $0x7] }
  0xbf   :  { %s528_s7 = sshll.u32 %s1199_s23, 4  ;;  %s1041_s9 = smov [#allocation2 + $0x9]  }
  0xc0   :  { %s189_s10 = sshll.u32 %s1041_s9, 4  ;;  %s161_s13 = scalar_lea.hbm %s1354_s1, %s528_s7  ;;  %s1219_s10 = int_to_ptr.vmem [resolvable:$true] %s189_s10 }
  0xc1   :  { %s781_s14 = scalar_lea.hbm %s161_s13, 16  ;;  %p784_p2 = scmp.lt.u32.totalorder %s161_s13, %s1354_s1 }
  0xc2   :  { %p782_p1 = scmp.ne.s32.totalorder %s161_s13, %s781_s14  ;;  %p785_p3 = scmp.lt.u32.totalorder %s1097_s8, %s781_s14 }
  0xc3   :  { %p787_p5 = scmp.lt.u32.totalorder %s781_s14, %s161_s13 }
  0xc4   :  { %p786_p4 = por %p785_p3, %p784_p2 }
  0xc6   :  { %p788_p6 = por %p787_p5, %p786_p4 }
  0xc8   :  { %p789_p7 = pnand %p788_p6, %p782_p1 }
  0xca   :  { %792 = shalt.err (!%p789_p7)  }
  0xcb   :  { %s793_s19 = scalar_lea.vmem %s1204_s26, 16  ;;  %p798_p9 = scmp.lt.s32.totalorder %s1204_s26, %s1080_s21 }
  0xcc   :  { %p794_p8 = scmp.ne.s32.totalorder %s1204_s26, %s793_s19  ;;  %p799_p10 = scmp.lt.s32.totalorder %s1106_s12, %s793_s19 }
  0xce   :  { %p800_p11 = por %p799_p10, %p798_p9 }
  0xd0   :  { %p801_p12 = pnand %p800_p11, %p794_p8 }
  0xd2   :  { %804 = shalt.err (!%p801_p12)  }
  0xd3   :  { %174 = dma.hbm_to_vmem [thread:$0]  %s161_s13, 16, %s1204_s26, [#allocation3 + $0x8] }
  0xd4   :  { %s530_s20 = sshll.u32 %s1201_s28, 4  ;;  %s1232_s17 = sld [smem:[#allocation5 + $0xa]] }
  0xd5   :  { %s179_s23 = scalar_lea.hbm %s1354_s1, %s530_s20 }
  0xd6   :  { %s805_s25 = scalar_lea.hbm %s179_s23, 16  ;;  %p808_p0 = scmp.lt.u32.totalorder %s179_s23, %s1354_s1 }
  0xd7   :  { %p806_p13 = scmp.ne.s32.totalorder %s179_s23, %s805_s25  ;;  %p809_p1 = scmp.lt.u32.totalorder %s1097_s8, %s805_s25 }
  0xd8   :  { %p811_p3 = scmp.lt.u32.totalorder %s805_s25, %s179_s23 }
  0xd9   :  { %p810_p2 = por %p809_p1, %p808_p0 }
  0xdb   :  { %p812_p4 = por %p811_p3, %p810_p2 }
  0xdd   :  { %p813_p5 = pnand %p812_p4, %p806_p13 }
  0xdf   :  { %816 = shalt.err (!%p813_p5)  }
  0xe0   :  { %s817_s26 = scalar_lea.vmem %s1219_s10, 16  ;;  %p822_p7 = scmp.lt.s32.totalorder %s1219_s10, %s1080_s21 }
  0xe1   :  { %p818_p6 = scmp.ne.s32.totalorder %s1219_s10, %s817_s26  ;;  %p823_p8 = scmp.lt.s32.totalorder %s1106_s12, %s817_s26 }
  0xe3   :  { %p824_p9 = por %p823_p8, %p822_p7 }
  0xe5   :  { %p825_p10 = pnand %p824_p9, %p818_p6 }
  0xe7   :  { %828 = shalt.err (!%p825_p10)  }
  0xe8   :  { %192 = dma.hbm_to_vmem [thread:$0]  %s179_s23, 16, %s1219_s10, [#allocation3 + $0x9] }
  0xe9   :  { %s1042_s28 = smov [#allocation2 + $0xa]   ;;  %s1247_s3 = sld [smem:[#allocation5 + $0xb]] }
  0xea   :  { %s207_s24 = sshll.u32 %s1042_s28, 4  ;;  %s1043_s4 = smov [#allocation2 + $0xb]   ;;  %s208_s24 = int_to_ptr.vmem [resolvable:$true] %s207_s24 }
  0xeb   :  { %s225_s5 = sshll.u32 %s1043_s4, 4  ;;  %s1249_s27 = sld [smem:[#allocation5 + $0xc]]  ;;  %s1252_s5 = int_to_ptr.vmem [resolvable:$true] %s225_s5 }
  0xec   :  { %s532_s6 = sshll.u32 %s1232_s17, 4 }
  0xed   :  { %s197_s11 = scalar_lea.hbm %s1354_s1, %s532_s6 }
  0xee   :  { %s829_s0 = scalar_lea.hbm %s197_s11, 16  ;;  %p832_p12 = scmp.lt.u32.totalorder %s197_s11, %s1354_s1 }
  0xef   :  { %p830_p11 = scmp.ne.s32.totalorder %s197_s11, %s829_s0  ;;  %p833_p13 = scmp.lt.u32.totalorder %s1097_s8, %s829_s0 }
  0xf0   :  { %p835_p1 = scmp.lt.u32.totalorder %s829_s0, %s197_s11 }
  0xf1   :  { %p834_p0 = por %p833_p13, %p832_p12 }
  0xf3   :  { %p836_p2 = por %p835_p1, %p834_p0 }
  0xf5   :  { %p837_p3 = pnand %p836_p2, %p830_p11 }
  0xf7   :  { %840 = shalt.err (!%p837_p3)  }
  0xf8   :  { %s841_s14 = scalar_lea.vmem %s208_s24, 16  ;;  %p846_p5 = scmp.lt.s32.totalorder %s208_s24, %s1080_s21 }
  0xf9   :  { %p842_p4 = scmp.ne.s32.totalorder %s208_s24, %s841_s14  ;;  %p847_p6 = scmp.lt.s32.totalorder %s1106_s12, %s841_s14 }
  0xfb   :  { %p848_p7 = por %p847_p6, %p846_p5 }
  0xfd   :  { %p849_p8 = pnand %p848_p7, %p842_p4 }
  0xff   :  { %852 = shalt.err (!%p849_p8)  }
 0x100   :  { %210 = dma.hbm_to_vmem [thread:$0]  %s197_s11, 16, %s208_s24, [#allocation3 + $0xa] }
 0x101   :  { %s534_s15 = sshll.u32 %s1247_s3, 4  ;;  %s1044_s16 = smov [#allocation2 + $0xc]  }
 0x102   :  { %s243_s19 = sshll.u32 %s1044_s16, 4  ;;  %s215_s18 = scalar_lea.hbm %s1354_s1, %s534_s15  ;;  %s1267_s19 = int_to_ptr.vmem [resolvable:$true] %s243_s19 }
 0x103   :  { %s853_s22 = scalar_lea.hbm %s215_s18, 16  ;;  %p856_p10 = scmp.lt.u32.totalorder %s215_s18, %s1354_s1 }
 0x104   :  { %p854_p9 = scmp.ne.s32.totalorder %s215_s18, %s853_s22  ;;  %p857_p11 = scmp.lt.u32.totalorder %s1097_s8, %s853_s22 }
 0x105   :  { %p859_p13 = scmp.lt.u32.totalorder %s853_s22, %s215_s18 }
 0x106   :  { %p858_p12 = por %p857_p11, %p856_p10 }
 0x108   :  { %p860_p0 = por %p859_p13, %p858_p12 }
 0x10a   :  { %p861_p1 = pnand %p860_p0, %p854_p9 }
 0x10c   :  { %864 = shalt.err (!%p861_p1)  }
 0x10d   :  { %s865_s29 = scalar_lea.vmem %s1252_s5, 16  ;;  %p870_p3 = scmp.lt.s32.totalorder %s1252_s5, %s1080_s21 }
 0x10e   :  { %p866_p2 = scmp.ne.s32.totalorder %s1252_s5, %s865_s29  ;;  %p871_p4 = scmp.lt.s32.totalorder %s1106_s12, %s865_s29 }
 0x110   :  { %p872_p5 = por %p871_p4, %p870_p3 }
 0x112   :  { %p873_p6 = pnand %p872_p5, %p866_p2 }
 0x114   :  { %876 = shalt.err (!%p873_p6)  }
 0x115   :  { %228 = dma.hbm_to_vmem [thread:$0]  %s215_s18, 16, %s1252_s5, [#allocation3 + $0xb] }
 0x116   :  { %s536_s30 = sshll.u32 %s1249_s27, 4  ;;  %s1280_s26 = sld [smem:[#allocation5 + $0xd]] }
 0x117   :  { %s233_s3 = scalar_lea.hbm %s1354_s1, %s536_s30 }
 0x118   :  { %s877_s4 = scalar_lea.hbm %s233_s3, 16  ;;  %p880_p8 = scmp.lt.u32.totalorder %s233_s3, %s1354_s1 }
 0x119   :  { %p878_p7 = scmp.ne.s32.totalorder %s233_s3, %s877_s4  ;;  %p881_p9 = scmp.lt.u32.totalorder %s1097_s8, %s877_s4 }
 0x11a   :  { %p883_p11 = scmp.lt.u32.totalorder %s877_s4, %s233_s3 }
 0x11b   :  { %p882_p10 = por %p881_p9, %p880_p8 }
 0x11d   :  { %p884_p12 = por %p883_p11, %p882_p10 }
 0x11f   :  { %p885_p13 = pnand %p884_p12, %p878_p7 }
 0x121   :  { %888 = shalt.err (!%p885_p13)  }
 0x122   :  { %s889_s5 = scalar_lea.vmem %s1267_s19, 16  ;;  %p894_p1 = scmp.lt.s32.totalorder %s1267_s19, %s1080_s21 }
 0x123   :  { %p890_p0 = scmp.ne.s32.totalorder %s1267_s19, %s889_s5  ;;  %p895_p2 = scmp.lt.s32.totalorder %s1106_s12, %s889_s5 }
 0x125   :  { %p896_p3 = por %p895_p2, %p894_p1 }
 0x127   :  { %p897_p4 = pnand %p896_p3, %p890_p0 }
 0x129   :  { %900 = shalt.err (!%p897_p4)  }
 0x12a   :  { %246 = dma.hbm_to_vmem [thread:$0]  %s233_s3, 16, %s1267_s19, [#allocation3 + $0xc] }
 0x12b   :  { %s1045_s27 = smov [#allocation2 + $0xd]   ;;  %s1295_s11 = sld [smem:[#allocation5 + $0xe]] }
 0x12c   :  { %s261_s9 = sshll.u32 %s1045_s27, 4  ;;  %s1046_s0 = smov [#allocation2 + $0xe]   ;;  %s262_s9 = int_to_ptr.vmem [resolvable:$true] %s261_s9 }
 0x12d   :  { %s279_s13 = sshll.u32 %s1046_s0, 4  ;;  %s1297_s10 = sld [smem:[#allocation5 + $0xf]]  ;;  %s1300_s13 = int_to_ptr.vmem [resolvable:$true] %s279_s13 }
 0x12e   :  { %s538_s14 = sshll.u32 %s1280_s26, 4 }
 0x12f   :  { %s251_s20 = scalar_lea.hbm %s1354_s1, %s538_s14 }
 0x130   :  { %s901_s17 = scalar_lea.hbm %s251_s20, 16  ;;  %p904_p6 = scmp.lt.u32.totalorder %s251_s20, %s1354_s1 }
 0x131   :  { %p902_p5 = scmp.ne.s32.totalorder %s251_s20, %s901_s17  ;;  %p905_p7 = scmp.lt.u32.totalorder %s1097_s8, %s901_s17 }
 0x132   :  { %p907_p9 = scmp.lt.u32.totalorder %s901_s17, %s251_s20 }
 0x133   :  { %p906_p8 = por %p905_p7, %p904_p6 }
 0x135   :  { %p908_p10 = por %p907_p9, %p906_p8 }
 0x137   :  { %p909_p11 = pnand %p908_p10, %p902_p5 }
 0x139   :  { %912 = shalt.err (!%p909_p11)  }
 0x13a   :  { %s913_s22 = scalar_lea.vmem %s262_s9, 16  ;;  %p918_p13 = scmp.lt.s32.totalorder %s262_s9, %s1080_s21 }
 0x13b   :  { %p914_p12 = scmp.ne.s32.totalorder %s262_s9, %s913_s22  ;;  %p919_p0 = scmp.lt.s32.totalorder %s1106_s12, %s913_s22 }
 0x13d   :  { %p920_p1 = por %p919_p0, %p918_p13 }
 0x13f   :  { %p921_p2 = pnand %p920_p1, %p914_p12 }
 0x141   :  { %924 = shalt.err (!%p921_p2)  }
 0x142   :  { %264 = dma.hbm_to_vmem [thread:$0]  %s251_s20, 16, %s262_s9, [#allocation3 + $0xd] }
 0x143   :  { %s540_s23 = sshll.u32 %s1295_s11, 4  ;;  %s1047_s25 = smov [#allocation2 + $0xf]  }
 0x144   :  { %s297_s29 = sshll.u32 %s1047_s25, 4  ;;  %s269_s28 = scalar_lea.hbm %s1354_s1, %s540_s23  ;;  %s1315_s29 = int_to_ptr.vmem [resolvable:$true] %s297_s29 }
 0x145   :  { %s925_s24 = scalar_lea.hbm %s269_s28, 16  ;;  %p928_p4 = scmp.lt.u32.totalorder %s269_s28, %s1354_s1 }
 0x146   :  { %p926_p3 = scmp.ne.s32.totalorder %s269_s28, %s925_s24  ;;  %p929_p5 = scmp.lt.u32.totalorder %s1097_s8, %s925_s24 }
 0x147   :  { %p931_p7 = scmp.lt.u32.totalorder %s925_s24, %s269_s28 }
 0x148   :  { %p930_p6 = por %p929_p5, %p928_p4 }
 0x14a   :  { %p932_p8 = por %p931_p7, %p930_p6 }
 0x14c   :  { %p933_p9 = pnand %p932_p8, %p926_p3 }
 0x14e   :  { %936 = shalt.err (!%p933_p9)  }
 0x14f   :  { %s937_s6 = scalar_lea.vmem %s1300_s13, 16  ;;  %p942_p11 = scmp.lt.s32.totalorder %s1300_s13, %s1080_s21 }
 0x150   :  { %p938_p10 = scmp.ne.s32.totalorder %s1300_s13, %s937_s6  ;;  %p943_p12 = scmp.lt.s32.totalorder %s1106_s12, %s937_s6 }
 0x152   :  { %p944_p13 = por %p943_p12, %p942_p11 }
 0x154   :  { %p945_p0 = pnand %p944_p13, %p938_p10 }
 0x156   :  { %948 = shalt.err (!%p945_p0)  }
 0x157   :  { %282 = dma.hbm_to_vmem [thread:$0]  %s269_s28, 16, %s1300_s13, [#allocation3 + $0xe] }
 0x158   :  { %s542_s7 = sshll.u32 %s1297_s10, 4 }
 0x159   :  { %s287_s9 = scalar_lea.hbm %s1354_s1, %s542_s7 }
 0x15a   :  { %s949_s11 = scalar_lea.hbm %s287_s9, 16  ;;  %p952_p2 = scmp.lt.u32.totalorder %s287_s9, %s1354_s1 }
 0x15b   :  { %p950_p1 = scmp.ne.s32.totalorder %s287_s9, %s949_s11  ;;  %p953_p3 = scmp.lt.u32.totalorder %s1097_s8, %s949_s11 }
 0x15c   :  { %p955_p5 = scmp.lt.u32.totalorder %s949_s11, %s287_s9 }
 0x15d   :  { %p954_p4 = por %p953_p3, %p952_p2 }
 0x15f   :  { %p956_p6 = por %p955_p5, %p954_p4 }
 0x161   :  { %p957_p7 = pnand %p956_p6, %p950_p1 }
 0x163   :  { %960 = shalt.err (!%p957_p7)  }
 0x164   :  { %s961_s13 = scalar_lea.vmem %s1315_s29, 16  ;;  %p966_p9 = scmp.lt.s32.totalorder %s1315_s29, %s1080_s21 }
 0x165   :  { %p962_p8 = scmp.ne.s32.totalorder %s1315_s29, %s961_s13  ;;  %p967_p10 = scmp.lt.s32.totalorder %s1106_s12, %s961_s13 }
 0x167   :  { %p968_p11 = por %p967_p10, %p966_p9 }
 0x169   :  { %p969_p12 = pnand %p968_p11, %p962_p8 }
 0x16b   :  { %972 = shalt.err (!%p969_p12)  }
 0x16c   :  { %300 = dma.hbm_to_vmem [thread:$0]  %s287_s9, 16, %s1315_s29, [#allocation3 + $0xf] }
 0x16d   :  { %997 = dma.done.wait [#allocation3], 16 }
 0x16e   :  { %998 = vsyncadd [#allocation3], 4294967280 }
 0x16f   :  { %999 = dma.done.wait [#allocation3 + $0x1], 16 }
 0x170   :  { %1000 = vsyncadd [#allocation3 + $0x1], 4294967280 }
 0x171   :  { %1001 = dma.done.wait [#allocation3 + $0x2], 16 }
 0x172   :  { %1002 = vsyncadd [#allocation3 + $0x2], 4294967280 }
 0x173   :  { %1003 = dma.done.wait [#allocation3 + $0x3], 16 }
 0x174   :  { %1004 = vsyncadd [#allocation3 + $0x3], 4294967280 }
 0x175   :  { %1005 = dma.done.wait [#allocation3 + $0x4], 16 }
 0x176   :  { %1006 = vsyncadd [#allocation3 + $0x4], 4294967280 }
 0x177   :  { %1007 = dma.done.wait [#allocation3 + $0x5], 16 }
 0x178   :  { %1008 = vsyncadd [#allocation3 + $0x5], 4294967280 }
 0x179   :  { %1009 = dma.done.wait [#allocation3 + $0x6], 16 }
 0x17a   :  { %1010 = vsyncadd [#allocation3 + $0x6], 4294967280 }
 0x17b   :  { %1011 = dma.done.wait [#allocation3 + $0x7], 16 }
 0x17c   :  { %1012 = vsyncadd [#allocation3 + $0x7], 4294967280 }
 0x17d   :  { %1013 = dma.done.wait [#allocation3 + $0x8], 16 }
 0x17e   :  { %1014 = vsyncadd [#allocation3 + $0x8], 4294967280 }
 0x17f   :  { %1015 = dma.done.wait [#allocation3 + $0x9], 16 }
 0x180   :  { %1016 = vsyncadd [#allocation3 + $0x9], 4294967280 }
 0x181   :  { %1017 = dma.done.wait [#allocation3 + $0xa], 16 }
 0x182   :  { %1018 = vsyncadd [#allocation3 + $0xa], 4294967280 }
 0x183   :  { %1019 = dma.done.wait [#allocation3 + $0xb], 16 }
 0x184   :  { %1020 = vsyncadd [#allocation3 + $0xb], 4294967280 }
 0x185   :  { %1021 = dma.done.wait [#allocation3 + $0xc], 16 }
 0x186   :  { %1022 = vsyncadd [#allocation3 + $0xc], 4294967280 }
 0x187   :  { %1023 = dma.done.wait [#allocation3 + $0xd], 16 }
 0x188   :  { %1024 = vsyncadd [#allocation3 + $0xd], 4294967280 }
 0x189   :  { %1025 = dma.done.wait [#allocation3 + $0xe], 16 }
 0x18a   :  { %1026 = vsyncadd [#allocation3 + $0xe], 4294967280 }
 0x18b   :  { %1027 = dma.done.wait [#allocation3 + $0xf], 16 }
 0x18c   :  { %1028 = vsyncadd [#allocation3 + $0xf], 4294967280  ;;  %s1048_s1 = smov [#allocation6]   ;;  %v333_v0 = vld [vmem:[#allocation2] sm:$0xff]  ;;  %v334_v1 = vld [vmem:[#allocation2 + $0x8] sm:$0xff] }
 0x18d   :  { %s342_s21 = sshll.u32 %s1048_s1, 4  ;;  %335 = vst [vmem:[#allocation6] sm:$0xff] %v333_v0  ;;  %336 = vst [vmem:[#allocation6 + $0x8] sm:$0xff] %v334_v1  ;;  %s343_s21 = int_to_ptr.vmem [resolvable:$true] %s342_s21 }
 0x18e   :  { %s973_s8 = scalar_lea.vmem %s343_s21, 256  ;;  %p978_p0 = scmp.lt.s32.totalorder %s343_s21, %s343_s21 }
 0x18f   :  { %p974_p13 = scmp.ne.s32.totalorder %s343_s21, %s973_s8  ;;  %p979_p1 = scmp.lt.s32.totalorder %s973_s8, %s973_s8 }
 0x191   :  { %p980_p2 = por %p979_p1, %p978_p0 }
 0x193   :  { %p981_p3 = pnand %p980_p2, %p974_p13 }
 0x195   :  { %984 = shalt.err (!%p981_p3)
}
 0x196   :  { %s985_s15 = scalar_lea.hbm %s1355_s2, 256 }
 0x197   :  { %p986_p4 = scmp.ne.s32.totalorder %s1355_s2, %s985_s15  ;;  %p989_p5 = scmp.lt.u32.totalorder %s985_s15, %s1355_s2 }
 0x199   :  { %p991_p6 = pnand %p989_p5, %p986_p4 }
 0x19b   :  { %994 = shalt.err (!%p991_p6)
}
 0x19c   :  { %s1049_s19 = smov 128   ;;  %s1050_s22 = smov 8  }
 0x19d   :  { %348 = dma.vmem_to_hbm [thread:$0]  %s343_s21, 256, %s1355_s2, [#allocation7], %s1049_s19, %s1049_s19, %s1050_s22  }
 0x19e   :  { %1029 = dma.done.wait [#allocation7], 256  }
 0x19f   :  { %1030 = vsyncadd [#allocation7], 4294967040 }
 0x1a0   :  { %352 = vsyncpa [#allocation7], 1 }
 0x1a1   :  { %353 = vsyncmov [#allocation3] }
 0x1a4   :  { %s354_s29 = vpop.sfrf %353 }
 0x1a5   :  { %p543_p7 = scmp.ne.s32.totalorder %s354_s29, 0 }
 0x1a7   :  { %358 = shalt.err (%p543_p7)  }
 0x1a8   :  { %360 = vsyncmov [#allocation3 + $0x1] }
 0x1ab   :  { %s361_s30 = vpop.sfrf %360 }
 0x1ac   :  { %p544_p8 = scmp.ne.s32.totalorder %s361_s30, 0 }
 0x1ae   :  { %365 = shalt.err (%p544_p8)  }
 0x1af   :  { %367 = vsyncmov [#allocation3 + $0x2] }
 0x1b2   :  { %s368_s26 = vpop.sfrf %367 }
 0x1b3   :  { %p545_p9 = scmp.ne.s32.totalorder %s368_s26, 0 }
 0x1b5   :  { %372 = shalt.err (%p545_p9)  }
 0x1b6   :  { %374 = vsyncmov [#allocation3 + $0x3] }
 0x1b9   :  { %s375_s28 = vpop.sfrf %374 }
 0x1ba   :  { %p546_p10 = scmp.ne.s32.totalorder %s375_s28, 0 }
 0x1bc   :  { %379 = shalt.err (%p546_p10)  }
 0x1bd   :  { %381 = vsyncmov [#allocation3 + $0x4] }
 0x1c0   :  { %s382_s2 = vpop.sfrf %381 }
 0x1c1   :  { %p547_p11 = scmp.ne.s32.totalorder %s382_s2, 0 }
 0x1c3   :  { %386 = shalt.err (%p547_p11)  }
 0x1c4   :  { %388 = vsyncmov [#allocation3 + $0x5] }
 0x1c7   :  { %s389_s24 = vpop.sfrf %388 }
 0x1c8   :  { %p548_p12 = scmp.ne.s32.totalorder %s389_s24, 0 }
 0x1ca   :  { %393 = shalt.err (%p548_p12)  }
 0x1cb   :  { %395 = vsyncmov [#allocation3 + $0x6] }
 0x1ce   :  { %s396_s3 = vpop.sfrf %395 }
 0x1cf   :  { %p549_p13 = scmp.ne.s32.totalorder %s396_s3, 0 }
 0x1d1   :  { %400 = shalt.err (%p549_p13)  }
 0x1d2   :  { %402 = vsyncmov [#allocation3 + $0x7] }
 0x1d5   :  { %s403_s4 = vpop.sfrf %402 }
 0x1d6   :  { %p550_p0 = scmp.ne.s32.totalorder %s403_s4, 0 }
 0x1d8   :  { %407 = shalt.err (%p550_p0)  }
 0x1d9   :  { %409 = vsyncmov [#allocation3 + $0x8] }
 0x1dc   :  { %s410_s6 = vpop.sfrf %409 }
 0x1dd   :  { %p551_p1 = scmp.ne.s32.totalorder %s410_s6, 0 }
 0x1df   :  { %414 = shalt.err (%p551_p1)  }
 0x1e0   :  { %416 = vsyncmov [#allocation3 + $0x9] }
 0x1e3   :  { %s417_s7 = vpop.sfrf %416 }
 0x1e4   :  { %p552_p2 = scmp.ne.s32.totalorder %s417_s7, 0 }
 0x1e6   :  { %421 = shalt.err (%p552_p2)  }
 0x1e7   :  { %423 = vsyncmov [#allocation3 + $0xa] }
 0x1ea   :  { %s424_s5 = vpop.sfrf %423 }
 0x1eb   :  { %p553_p3 = scmp.ne.s32.totalorder %s424_s5, 0 }
 0x1ed   :  { %428 = shalt.err (%p553_p3)  }
 0x1ee   :  { %430 = vsyncmov [#allocation3 + $0xb] }
 0x1f1   :  { %s431_s27 = vpop.sfrf %430 }
 0x1f2   :  { %p554_p4 = scmp.ne.s32.totalorder %s431_s27, 0 }
 0x1f4   :  { %435 = shalt.err (%p554_p4)  }
 0x1f5   :  { %437 = vsyncmov [#allocation3 + $0xc] }
 0x1f8   :  { %s438_s9 = vpop.sfrf %437 }
 0x1f9   :  { %p555_p5 = scmp.ne.s32.totalorder %s438_s9, 0 }
 0x1fb   :  { %442 = shalt.err (%p555_p5)  }
 0x1fc   :  { %444 = vsyncmov [#allocation3 + $0xd] }
 0x1ff   :  { %s445_s11 = vpop.sfrf %444 }
 0x200   :  { %p556_p6 = scmp.ne.s32.totalorder %s445_s11, 0 }
 0x202   :  { %449 = shalt.err (%p556_p6)  }
 0x203   :  { %451 = vsyncmov [#allocation3 + $0xe] }
 0x206   :  { %s452_s0 = vpop.sfrf %451 }
 0x207   :  { %p557_p7 = scmp.ne.s32.totalorder %s452_s0, 0 }
 0x209   :  { %456 = shalt.err (%p557_p7)  }
 0x20a   :  { %458 = vsyncmov [#allocation3 + $0xf] }
 0x20d   :  { %s459_s14 = vpop.sfrf %458 }
 0x20e   :  { %p558_p8 = scmp.ne.s32.totalorder %s459_s14, 0 }
 0x210   :  { %463 = shalt.err (%p558_p8)  }

</bundles_post_ra>
